<compile_context>
chip_gen: v5e
topology: v5e:2x2
jax: 0.10.0
libtpu: 0.0.40
codegen_flags: <defaults>
</compile_context>

<pallas_src>
import jax
import jax.numpy as jnp
import numpy as np
from jax import lax
from jax.experimental import pallas as pl
from jax.experimental.pallas import tpu as pltpu


# ---------------------------------------------------------------------------
# Pallas kernel: full forward pass for one batch tile.
# ---------------------------------------------------------------------------
def _weather_kernel(x_ref,     # (T, Bt, F)  time-major, batch-tiled input
                    wih0_ref,  # (F, 4H)
                    whh0_ref,  # (H, 4H)
                    b0_ref,    # (1, 4H)  = b_ih0 + b_hh0
                    wih1_ref,  # (H, 4H)
                    whh1_ref,  # (H, 4H)
                    b1_ref,    # (1, 4H)  = b_ih1 + b_hh1
                    wh_ref,    # (H, OUT) fused head weight  (Wl1 @ Wl2)
                    bh_ref,    # (1, OUT) fused head bias    (bl1 @ Wl2 + bl2)
                    y_ref):    # (Bt, OUT)
    T, Bt, F = x_ref.shape
    H = whh0_ref.shape[0]

    # ---- weights: loaded once, reused across the whole unrolled loop -------
    whh0 = whh0_ref[...]
    wih1 = wih1_ref[...]
    whh1 = whh1_ref[...]
    # hoisted broadcast (JAX does not CSE broadcast_in_dim inside the unroll)
    b1 = jnp.broadcast_to(b1_ref[...], (Bt, 4 * H))

    # ---- layer-0 input projection for ALL timesteps in one MXU call,
    # hoisted off the serial recurrence: (T*Bt, F) @ (F, 4H) + b0 ------------
    # (leading-dim collapse of (T, Bt, F) with Bt a sublane multiple is free)
    # TODO(synk): for large T*Bt*4H (v7x has only 64 MiB VMEM) tile the time
    # axis with a grid / fori_loop over T-chunks instead of materializing xw0.
    x_flat = x_ref[...].reshape(T * Bt, F)
    xw0 = jnp.dot(x_flat, wih0_ref[...],
                  preferred_element_type=jnp.float32) + b0_ref[...]

    # lane mask selecting the g-gate lanes (gate order [i, f, g, o]; 4H lanes)
    lane = lax.broadcasted_iota(jnp.int32, (Bt, 4 * H), 1)
    is_g = (lane >= 2 * H) & (lane < 3 * H)

    def act_fn(pre):
        # Single full-tile EUP tanh; sigmoid(x) = 0.5 * (1 + tanh(x / 2)).
        z = jnp.where(is_g, pre, 0.5 * pre)
        t = jnp.tanh(z)
        return jnp.where(is_g, t, 0.5 * t + 0.5)

    def split_gates(act):
        return (act[:, 0 * H:1 * H], act[:, 1 * H:2 * H],
                act[:, 2 * H:3 * H], act[:, 3 * H:4 * H])

    def gates(pre, c):
        i_g, f_g, g_g, o_g = split_gates(act_fn(pre))
        c_new = f_g * c + i_g * g_g
        h_new = o_g * jnp.tanh(c_new)
        return h_new, c_new

    def gates_zero_state(pre):
        # h = c = 0 specialization for the peeled first step: skip f * c.
        i_g, _, g_g, o_g = split_gates(act_fn(pre))
        c_new = i_g * g_g
        h_new = o_g * jnp.tanh(c_new)
        return h_new, c_new

    # ---- peeled step t = 0: initial h/c are zero -> skip both h@whh dots ---
    pre0 = xw0[0:Bt, :]
    h0, c0 = gates_zero_state(pre0)
    # TODO(synk): inter-layer LSTM dropout (p=0.2) only applies in training;
    # eval-mode (identity) semantics are implemented here.
    pre1 = jnp.dot(h0, wih1, preferred_element_type=jnp.float32) + b1
    h1, c1 = gates_zero_state(pre1)

    # ---- remaining steps, fully unrolled at trace time (T is small) --------
    # TODO(synk): for long sequences switch to lax.fori_loop(..., unroll=2-4)
    # carrying (h0, c0, h1, c1) and slicing xw0 with pl.ds/pl.multiple_of.
    for t in range(1, T):
        xw_t = xw0[t * Bt:(t + 1) * Bt, :]                       # (Bt, 4H)
        pre0 = xw_t + jnp.dot(h0, whh0, preferred_element_type=jnp.float32)
        h0, c0 = gates(pre0, c0)
        # two separate dots: h1@whh1 only depends on previous-step h1 and can
        # be overlapped by the scheduler; concat-fusion would serialize it.
        pre1 = (jnp.dot(h0, wih1, preferred_element_type=jnp.float32)
                + jnp.dot(h1, whh1, preferred_element_type=jnp.float32)
                + b1)
        h1, c1 = gates(pre1, c1)

    # fused head: Linear(H, H//2) o Linear(H//2, OUT) == single (H, OUT) matmul
    y = jnp.dot(h1, wh_ref[...], preferred_element_type=jnp.float32) + bh_ref[...]
    y_ref[...] = y.astype(y_ref.dtype)


# ---------------------------------------------------------------------------
# Wrapper: layout plumbing (batch pad, time-major transpose, batch-tile grid).
# ---------------------------------------------------------------------------
def weather_predicter_forward(x, params):
    """x: (B, T, F) float32; params: dict of pre-transposed / pre-fused weights."""
    B, T, F = x.shape
    H = params["whh0_t"].shape[0]
    OUT = params["w_head"].shape[1]

    # pad batch to the f32 sublane tile (8) so every (B, .) tile is dense
    Bp = max(8, ((B + 7) // 8) * 8)
    Bt = 8                                   # batch tile per grid step
    x_p = jnp.pad(x, ((0, Bp - B), (0, 0), (0, 0)))
    x_tbf = jnp.transpose(x_p, (1, 0, 2))    # (T, Bp, F) time-major

    # TODO(synk): for v6e/v7x at larger H, store weights in bf16 (keeping
    # preferred_element_type=f32 on the dots) and re-validate against f32.
    grid = (Bp // Bt,)
    in_specs = [
        pl.BlockSpec((T, Bt, F), lambda b: (0, b, 0)),       # x, blocked on batch
        pl.BlockSpec((F, 4 * H), lambda b: (0, 0)),          # wih0 (replicated)
        pl.BlockSpec((H, 4 * H), lambda b: (0, 0)),          # whh0
        pl.BlockSpec((1, 4 * H), lambda b: (0, 0)),          # b0
        pl.BlockSpec((H, 4 * H), lambda b: (0, 0)),          # wih1
        pl.BlockSpec((H, 4 * H), lambda b: (0, 0)),          # whh1
        pl.BlockSpec((1, 4 * H), lambda b: (0, 0)),          # b1
        pl.BlockSpec((H, OUT), lambda b: (0, 0)),            # w_head
        pl.BlockSpec((1, OUT), lambda b: (0, 0)),            # b_head
    ]
    y_pad = pl.pallas_call(
        _weather_kernel,
        out_shape=jax.ShapeDtypeStruct((Bp, OUT), jnp.float32),
        grid=grid,
        in_specs=in_specs,
        out_specs=pl.BlockSpec((Bt, OUT), lambda b: (b, 0)),
        compiler_params=pltpu.CompilerParams(
            dimension_semantics=("parallel",)),   # uses both TCs on v7x
    )(x_tbf,
      params["wih0_t"], params["whh0_t"], params["b0"],
      params["wih1_t"], params["whh1_t"], params["b1"],
      params["w_head"], params["b_head"])
    return y_pad[:B]


# ---------------------------------------------------------------------------
# Deterministic parameter init (mirrors the shapes nn.LSTM / nn.Linear create).
# Head fusion (w_head/b_head) is done ONCE here, not per forward call.
# ---------------------------------------------------------------------------
def init_params(key, input_shape, hidden_size, output_shape):
    H, F, OUT = hidden_size, input_shape, output_shape
    ks = jax.random.split(key, 12)
    u = lambda k, shape, bound: jax.random.uniform(
        k, shape, jnp.float32, minval=-bound, maxval=bound)

    blstm = 1.0 / np.sqrt(H)
    # layer 0
    w_ih0 = u(ks[0], (4 * H, F), blstm)
    w_hh0 = u(ks[1], (4 * H, H), blstm)
    b_ih0 = u(ks[2], (4 * H,), blstm)
    b_hh0 = u(ks[3], (4 * H,), blstm)
    # layer 1 (input is h of layer 0, size H)
    w_ih1 = u(ks[4], (4 * H, H), blstm)
    w_hh1 = u(ks[5], (4 * H, H), blstm)
    b_ih1 = u(ks[6], (4 * H,), blstm)
    b_hh1 = u(ks[7], (4 * H,), blstm)
    # Linear(H, H//2), Linear(H//2, OUT)
    w_l1 = u(ks[8], (H // 2, H), 1.0 / np.sqrt(H))
    b_l1 = u(ks[9], (H // 2,), 1.0 / np.sqrt(H))
    w_l2 = u(ks[10], (OUT, H // 2), 1.0 / np.sqrt(H // 2))
    b_l2 = u(ks[11], (OUT,), 1.0 / np.sqrt(H // 2))

    wl1_t, wl2_t = w_l1.T, w_l2.T
    bl1, bl2 = b_l1[None, :], b_l2[None, :]
    # fused head (no activation between the two Linears in the PyTorch module)
    w_head = wl1_t @ wl2_t                     # (H, OUT)
    b_head = bl1 @ wl2_t + bl2                 # (1, OUT)

    return {
        "wih0_t": w_ih0.T, "whh0_t": w_hh0.T, "b0": (b_ih0 + b_hh0)[None, :],
        "wih1_t": w_ih1.T, "whh1_t": w_hh1.T, "b1": (b_ih1 + b_hh1)[None, :],
        "wl1_t": wl1_t, "bl1": bl1, "wl2_t": wl2_t, "bl2": bl2,
        "w_head": w_head, "b_head": b_head,
    }


# ---------------------------------------------------------------------------
# Pure-JAX reference (eval-mode LSTM, two separate head Linears).
# ---------------------------------------------------------------------------
def reference_forward(x, p):
    B, T, F = x.shape
    H = p["whh0_t"].shape[0]

    def cell(carry, inp, wih_t, whh_t, b):
        h, c = carry
        pre = inp @ wih_t + h @ whh_t + b
        i = jax.nn.sigmoid(pre[:, 0 * H:1 * H])
        f = jax.nn.sigmoid(pre[:, 1 * H:2 * H])
        g = jnp.tanh(pre[:, 2 * H:3 * H])
        o = jax.nn.sigmoid(pre[:, 3 * H:4 * H])
        c = f * c + i * g
        h = o * jnp.tanh(c)
        return (h, c), h

    def step(carry, x_t):
        (h0, c0), (h1, c1) = carry
        (h0, c0), out0 = cell((h0, c0), x_t, p["wih0_t"], p["whh0_t"], p["b0"])
        (h1, c1), out1 = cell((h1, c1), out0, p["wih1_t"], p["whh1_t"], p["b1"])
        return ((h0, c0), (h1, c1)), out1

    zeros = jnp.zeros((B, H), jnp.float32)
    carry0 = ((zeros, zeros), (zeros, zeros))
    _, hs = lax.scan(step, carry0, jnp.swapaxes(x, 0, 1))  # (T, B, H)
    z = hs[-1]
    z = z @ p["wl1_t"] + p["bl1"]
    return z @ p["wl2_t"] + p["bl2"]


if __name__ == "__main__":
    B, T, F, H, OUT = 2, 8, 16, 32, 4

    key = jax.random.PRNGKey(0)
    kx, kp = jax.random.split(key)
    x = jax.random.normal(kx, (B, T, F), jnp.float32)
    params = init_params(kp, F, H, OUT)

    y = weather_predicter_forward(x, params)
    y = jax.block_until_ready(y)

    y_ref = reference_forward(x, params)
    np.testing.assert_allclose(np.asarray(y), np.asarray(y_ref), rtol=1e-5, atol=1e-5)

    print("KERNEL_OK")
</pallas_src>

<mosaic_0001>
module attributes {stable_mosaic.version = 11 : i64} {
  func.func @_weather_kernel(%arg0: i32, %arg1: memref<8x8x16xf32, #tpu.memory_space<vmem>>, %arg2: memref<16x128xf32, #tpu.memory_space<vmem>>, %arg3: memref<32x128xf32, #tpu.memory_space<vmem>>, %arg4: memref<1x128xf32, #tpu.memory_space<vmem>>, %arg5: memref<32x128xf32, #tpu.memory_space<vmem>>, %arg6: memref<32x128xf32, #tpu.memory_space<vmem>>, %arg7: memref<1x128xf32, #tpu.memory_space<vmem>>, %arg8: memref<32x4xf32, #tpu.memory_space<vmem>>, %arg9: memref<1x4xf32, #tpu.memory_space<vmem>>, %arg10: memref<8x4xf32, #tpu.memory_space<vmem>>) attributes {dimension_semantics = [#tpu.dimension_semantics<parallel>], iteration_bounds = array<i64: 1>, scalar_prefetch = 0 : i64, scratch_operands = 0 : i64, tpu.core_type = #tpu.core_type<tc>, window_params = [{transform_indices = @transform_0, window_bounds = array<i64: 8, 8, 16>}, {pipeline_mode = #tpu.pipeline_mode<synchronous>, transform_indices = @transform_1, window_bounds = array<i64: 16, 128>}, {pipeline_mode = #tpu.pipeline_mode<synchronous>, transform_indices = @transform_2, window_bounds = array<i64: 32, 128>}, {pipeline_mode = #tpu.pipeline_mode<synchronous>, transform_indices = @transform_3, window_bounds = array<i64: 1, 128>}, {pipeline_mode = #tpu.pipeline_mode<synchronous>, transform_indices = @transform_4, window_bounds = array<i64: 32, 128>}, {pipeline_mode = #tpu.pipeline_mode<synchronous>, transform_indices = @transform_5, window_bounds = array<i64: 32, 128>}, {pipeline_mode = #tpu.pipeline_mode<synchronous>, transform_indices = @transform_6, window_bounds = array<i64: 1, 128>}, {pipeline_mode = #tpu.pipeline_mode<synchronous>, transform_indices = @transform_7, window_bounds = array<i64: 32, 4>}, {pipeline_mode = #tpu.pipeline_mode<synchronous>, transform_indices = @transform_8, window_bounds = array<i64: 1, 4>}, {transform_indices = @transform_9, window_bounds = array<i64: 8, 4>}]} {
    %c0 = arith.constant 0 : index
    %c0_0 = arith.constant 0 : index
    %0 = vector.load %arg3[%c0, %c0_0] : memref<32x128xf32, #tpu.memory_space<vmem>>, vector<32x128xf32>
    %c0_1 = arith.constant 0 : index
    %c0_2 = arith.constant 0 : index
    %1 = vector.load %arg5[%c0_1, %c0_2] : memref<32x128xf32, #tpu.memory_space<vmem>>, vector<32x128xf32>
    %c0_3 = arith.constant 0 : index
    %c0_4 = arith.constant 0 : index
    %2 = vector.load %arg6[%c0_3, %c0_4] : memref<32x128xf32, #tpu.memory_space<vmem>>, vector<32x128xf32>
    %c0_5 = arith.constant 0 : index
    %c0_6 = arith.constant 0 : index
    %3 = vector.load %arg7[%c0_5, %c0_6] : memref<1x128xf32, #tpu.memory_space<vmem>>, vector<1x128xf32>
    %4 = vector.shape_cast %3 : vector<1x128xf32> to vector<1x128xf32>
    %5 = vector.broadcast %4 : vector<1x128xf32> to vector<8x128xf32>
    %c0_7 = arith.constant 0 : index
    %c0_8 = arith.constant 0 : index
    %c0_9 = arith.constant 0 : index
    %6 = vector.load %arg1[%c0_7, %c0_8, %c0_9] : memref<8x8x16xf32, #tpu.memory_space<vmem>>, vector<8x8x16xf32>
    %7 = vector.shape_cast %6 : vector<8x8x16xf32> to vector<64x16xf32>
    %c0_10 = arith.constant 0 : index
    %c0_11 = arith.constant 0 : index
    %8 = vector.load %arg2[%c0_10, %c0_11] : memref<16x128xf32, #tpu.memory_space<vmem>>, vector<16x128xf32>
    %cst = arith.constant dense<0.000000e+00> : vector<64x128xf32>
    %9 = tpu.matmul %7, %8, %cst {dimension_numbers = #tpu.dot_dimension_numbers<[1], [0], [0], [1], [0, 0, 1, 1], [], []>} : vector<64x16xf32>, vector<16x128xf32>, vector<64x128xf32> -> vector<64x128xf32>
    %c0_12 = arith.constant 0 : index
    %c0_13 = arith.constant 0 : index
    %10 = vector.load %arg4[%c0_12, %c0_13] : memref<1x128xf32, #tpu.memory_space<vmem>>, vector<1x128xf32>
    %11 = vector.broadcast %10 : vector<1x128xf32> to vector<64x128xf32>
    %12 = arith.addf %9, %11 : vector<64x128xf32>
    %13 = tpu.iota {dimensions = array<i32: 1>} : vector<8x128xi32>
    %c64_i32 = arith.constant 64 : i32
    %14 = vector.broadcast %c64_i32 : i32 to vector<8x128xi32>
    %15 = arith.cmpi sge, %13, %14 : vector<8x128xi32>
    %c96_i32 = arith.constant 96 : i32
    %16 = vector.broadcast %c96_i32 : i32 to vector<8x128xi32>
    %17 = arith.cmpi slt, %13, %16 : vector<8x128xi32>
    %18 = arith.andi %15, %17 : vector<8x128xi1>
    %19 = vector.extract_strided_slice %12 {offsets = [0, 0], sizes = [8, 128], strides = [1, 1]} : vector<64x128xf32> to vector<8x128xf32>
    %cst_14 = arith.constant 5.000000e-01 : f32
    %20 = vector.broadcast %cst_14 : f32 to vector<8x128xf32>
    %21 = arith.mulf %20, %19 : vector<8x128xf32>
    %22 = arith.select %18, %19, %21 : vector<8x128xi1>, vector<8x128xf32>
    %23 = math.tanh %22 : vector<8x128xf32>
    %cst_15 = arith.constant 5.000000e-01 : f32
    %24 = vector.broadcast %cst_15 : f32 to vector<8x128xf32>
    %25 = arith.mulf %24, %23 : vector<8x128xf32>
    %cst_16 = arith.constant 5.000000e-01 : f32
    %26 = vector.broadcast %cst_16 : f32 to vector<8x128xf32>
    %27 = arith.addf %25, %26 : vector<8x128xf32>
    %28 = arith.select %18, %23, %27 : vector<8x128xi1>, vector<8x128xf32>
    %29 = vector.extract_strided_slice %28 {offsets = [0, 0], sizes = [8, 32], strides = [1, 1]} : vector<8x128xf32> to vector<8x32xf32>
    %30 = vector.extract_strided_slice %28 {offsets = [0, 64], sizes = [8, 32], strides = [1, 1]} : vector<8x128xf32> to vector<8x32xf32>
    %31 = vector.extract_strided_slice %28 {offsets = [0, 96], sizes = [8, 32], strides = [1, 1]} : vector<8x128xf32> to vector<8x32xf32>
    %32 = arith.mulf %29, %30 : vector<8x32xf32>
    %33 = math.tanh %32 : vector<8x32xf32>
    %34 = arith.mulf %31, %33 : vector<8x32xf32>
    %cst_17 = arith.constant dense<0.000000e+00> : vector<8x128xf32>
    %35 = tpu.matmul %34, %1, %cst_17 {dimension_numbers = #tpu.dot_dimension_numbers<[1], [0], [0], [1], [0, 0, 1, 1], [], []>} : vector<8x32xf32>, vector<32x128xf32>, vector<8x128xf32> -> vector<8x128xf32>
    %36 = arith.addf %35, %5 : vector<8x128xf32>
    %cst_18 = arith.constant 5.000000e-01 : f32
    %37 = vector.broadcast %cst_18 : f32 to vector<8x128xf32>
    %38 = arith.mulf %37, %36 : vector<8x128xf32>
    %39 = arith.select %18, %36, %38 : vector<8x128xi1>, vector<8x128xf32>
    %40 = math.tanh %39 : vector<8x128xf32>
    %cst_19 = arith.constant 5.000000e-01 : f32
    %41 = vector.broadcast %cst_19 : f32 to vector<8x128xf32>
    %42 = arith.mulf %41, %40 : vector<8x128xf32>
    %cst_20 = arith.constant 5.000000e-01 : f32
    %43 = vector.broadcast %cst_20 : f32 to vector<8x128xf32>
    %44 = arith.addf %42, %43 : vector<8x128xf32>
    %45 = arith.select %18, %40, %44 : vector<8x128xi1>, vector<8x128xf32>
    %46 = vector.extract_strided_slice %45 {offsets = [0, 0], sizes = [8, 32], strides = [1, 1]} : vector<8x128xf32> to vector<8x32xf32>
    %47 = vector.extract_strided_slice %45 {offsets = [0, 64], sizes = [8, 32], strides = [1, 1]} : vector<8x128xf32> to vector<8x32xf32>
    %48 = vector.extract_strided_slice %45 {offsets = [0, 96], sizes = [8, 32], strides = [1, 1]} : vector<8x128xf32> to vector<8x32xf32>
    %49 = arith.mulf %46, %47 : vector<8x32xf32>
    %50 = math.tanh %49 : vector<8x32xf32>
    %51 = arith.mulf %48, %50 : vector<8x32xf32>
    %52 = vector.extract_strided_slice %12 {offsets = [8, 0], sizes = [8, 128], strides = [1, 1]} : vector<64x128xf32> to vector<8x128xf32>
    %cst_21 = arith.constant dense<0.000000e+00> : vector<8x128xf32>
    %53 = tpu.matmul %34, %0, %cst_21 {dimension_numbers = #tpu.dot_dimension_numbers<[1], [0], [0], [1], [0, 0, 1, 1], [], []>} : vector<8x32xf32>, vector<32x128xf32>, vector<8x128xf32> -> vector<8x128xf32>
    %54 = arith.addf %52, %53 : vector<8x128xf32>
    %cst_22 = arith.constant 5.000000e-01 : f32
    %55 = vector.broadcast %cst_22 : f32 to vector<8x128xf32>
    %56 = arith.mulf %55, %54 : vector<8x128xf32>
    %57 = arith.select %18, %54, %56 : vector<8x128xi1>, vector<8x128xf32>
    %58 = math.tanh %57 : vector<8x128xf32>
    %cst_23 = arith.constant 5.000000e-01 : f32
    %59 = vector.broadcast %cst_23 : f32 to vector<8x128xf32>
    %60 = arith.mulf %59, %58 : vector<8x128xf32>
    %cst_24 = arith.constant 5.000000e-01 : f32
    %61 = vector.broadcast %cst_24 : f32 to vector<8x128xf32>
    %62 = arith.addf %60, %61 : vector<8x128xf32>
    %63 = arith.select %18, %58, %62 : vector<8x128xi1>, vector<8x128xf32>
    %64 = vector.extract_strided_slice %63 {offsets = [0, 0], sizes = [8, 32], strides = [1, 1]} : vector<8x128xf32> to vector<8x32xf32>
    %65 = vector.extract_strided_slice %63 {offsets = [0, 32], sizes = [8, 32], strides = [1, 1]} : vector<8x128xf32> to vector<8x32xf32>
    %66 = vector.extract_strided_slice %63 {offsets = [0, 64], sizes = [8, 32], strides = [1, 1]} : vector<8x128xf32> to vector<8x32xf32>
    %67 = vector.extract_strided_slice %63 {offsets = [0, 96], sizes = [8, 32], strides = [1, 1]} : vector<8x128xf32> to vector<8x32xf32>
    %68 = arith.mulf %65, %32 : vector<8x32xf32>
    %69 = arith.mulf %64, %66 : vector<8x32xf32>
    %70 = arith.addf %68, %69 : vector<8x32xf32>
    %71 = math.tanh %70 : vector<8x32xf32>
    %72 = arith.mulf %67, %71 : vector<8x32xf32>
    %cst_25 = arith.constant dense<0.000000e+00> : vector<8x128xf32>
    %73 = tpu.matmul %72, %1, %cst_25 {dimension_numbers = #tpu.dot_dimension_numbers<[1], [0], [0], [1], [0, 0, 1, 1], [], []>} : vector<8x32xf32>, vector<32x128xf32>, vector<8x128xf32> -> vector<8x128xf32>
    %cst_26 = arith.constant dense<0.000000e+00> : vector<8x128xf32>
    %74 = tpu.matmul %51, %2, %cst_26 {dimension_numbers = #tpu.dot_dimension_numbers<[1], [0], [0], [1], [0, 0, 1, 1], [], []>} : vector<8x32xf32>, vector<32x128xf32>, vector<8x128xf32> -> vector<8x128xf32>
    %75 = arith.addf %73, %74 : vector<8x128xf32>
    %76 = arith.addf %75, %5 : vector<8x128xf32>
    %cst_27 = arith.constant 5.000000e-01 : f32
    %77 = vector.broadcast %cst_27 : f32 to vector<8x128xf32>
    %78 = arith.mulf %77, %76 : vector<8x128xf32>
    %79 = arith.select %18, %76, %78 : vector<8x128xi1>, vector<8x128xf32>
    %80 = math.tanh %79 : vector<8x128xf32>
    %cst_28 = arith.constant 5.000000e-01 : f32
    %81 = vector.broadcast %cst_28 : f32 to vector<8x128xf32>
    %82 = arith.mulf %81, %80 : vector<8x128xf32>
    %cst_29 = arith.constant 5.000000e-01 : f32
    %83 = vector.broadcast %cst_29 : f32 to vector<8x128xf32>
    %84 = arith.addf %82, %83 : vector<8x128xf32>
    %85 = arith.select %18, %80, %84 : vector<8x128xi1>, vector<8x128xf32>
    %86 = vector.extract_strided_slice %85 {offsets = [0, 0], sizes = [8, 32], strides = [1, 1]} : vector<8x128xf32> to vector<8x32xf32>
    %87 = vector.extract_strided_slice %85 {offsets = [0, 32], sizes = [8, 32], strides = [1, 1]} : vector<8x128xf32> to vector<8x32xf32>
    %88 = vector.extract_strided_slice %85 {offsets = [0, 64], sizes = [8, 32], strides = [1, 1]} : vector<8x128xf32> to vector<8x32xf32>
    %89 = vector.extract_strided_slice %85 {offsets = [0, 96], sizes = [8, 32], strides = [1, 1]} : vector<8x128xf32> to vector<8x32xf32>
    %90 = arith.mulf %87, %49 : vector<8x32xf32>
    %91 = arith.mulf %86, %88 : vector<8x32xf32>
    %92 = arith.addf %90, %91 : vector<8x32xf32>
    %93 = math.tanh %92 : vector<8x32xf32>
    %94 = arith.mulf %89, %93 : vector<8x32xf32>
    %95 = vector.extract_strided_slice %12 {offsets = [16, 0], sizes = [8, 128], strides = [1, 1]} : vector<64x128xf32> to vector<8x128xf32>
    %cst_30 = arith.constant dense<0.000000e+00> : vector<8x128xf32>
    %96 = tpu.matmul %72, %0, %cst_30 {dimension_numbers = #tpu.dot_dimension_numbers<[1], [0], [0], [1], [0, 0, 1, 1], [], []>} : vector<8x32xf32>, vector<32x128xf32>, vector<8x128xf32> -> vector<8x128xf32>
    %97 = arith.addf %95, %96 : vector<8x128xf32>
    %cst_31 = arith.constant 5.000000e-01 : f32
    %98 = vector.broadcast %cst_31 : f32 to vector<8x128xf32>
    %99 = arith.mulf %98, %97 : vector<8x128xf32>
    %100 = arith.select %18, %97, %99 : vector<8x128xi1>, vector<8x128xf32>
    %101 = math.tanh %100 : vector<8x128xf32>
    %cst_32 = arith.constant 5.000000e-01 : f32
    %102 = vector.broadcast %cst_32 : f32 to vector<8x128xf32>
    %103 = arith.mulf %102, %101 : vector<8x128xf32>
    %cst_33 = arith.constant 5.000000e-01 : f32
    %104 = vector.broadcast %cst_33 : f32 to vector<8x128xf32>
    %105 = arith.addf %103, %104 : vector<8x128xf32>
    %106 = arith.select %18, %101, %105 : vector<8x128xi1>, vector<8x128xf32>
    %107 = vector.extract_strided_slice %106 {offsets = [0, 0], sizes = [8, 32], strides = [1, 1]} : vector<8x128xf32> to vector<8x32xf32>
    %108 = vector.extract_strided_slice %106 {offsets = [0, 32], sizes = [8, 32], strides = [1, 1]} : vector<8x128xf32> to vector<8x32xf32>
    %109 = vector.extract_strided_slice %106 {offsets = [0, 64], sizes = [8, 32], strides = [1, 1]} : vector<8x128xf32> to vector<8x32xf32>
    %110 = vector.extract_strided_slice %106 {offsets = [0, 96], sizes = [8, 32], strides = [1, 1]} : vector<8x128xf32> to vector<8x32xf32>
    %111 = arith.mulf %108, %70 : vector<8x32xf32>
    %112 = arith.mulf %107, %109 : vector<8x32xf32>
    %113 = arith.addf %111, %112 : vector<8x32xf32>
    %114 = math.tanh %113 : vector<8x32xf32>
    %115 = arith.mulf %110, %114 : vector<8x32xf32>
    %cst_34 = arith.constant dense<0.000000e+00> : vector<8x128xf32>
    %116 = tpu.matmul %115, %1, %cst_34 {dimension_numbers = #tpu.dot_dimension_numbers<[1], [0], [0], [1], [0, 0, 1, 1], [], []>} : vector<8x32xf32>, vector<32x128xf32>, vector<8x128xf32> -> vector<8x128xf32>
    %cst_35 = arith.constant dense<0.000000e+00> : vector<8x128xf32>
    %117 = tpu.matmul %94, %2, %cst_35 {dimension_numbers = #tpu.dot_dimension_numbers<[1], [0], [0], [1], [0, 0, 1, 1], [], []>} : vector<8x32xf32>, vector<32x128xf32>, vector<8x128xf32> -> vector<8x128xf32>
    %118 = arith.addf %116, %117 : vector<8x128xf32>
    %119 = arith.addf %118, %5 : vector<8x128xf32>
    %cst_36 = arith.constant 5.000000e-01 : f32
    %120 = vector.broadcast %cst_36 : f32 to vector<8x128xf32>
    %121 = arith.mulf %120, %119 : vector<8x128xf32>
    %122 = arith.select %18, %119, %121 : vector<8x128xi1>, vector<8x128xf32>
    %123 = math.tanh %122 : vector<8x128xf32>
    %cst_37 = arith.constant 5.000000e-01 : f32
    %124 = vector.broadcast %cst_37 : f32 to vector<8x128xf32>
    %125 = arith.mulf %124, %123 : vector<8x128xf32>
    %cst_38 = arith.constant 5.000000e-01 : f32
    %126 = vector.broadcast %cst_38 : f32 to vector<8x128xf32>
    %127 = arith.addf %125, %126 : vector<8x128xf32>
    %128 = arith.select %18, %123, %127 : vector<8x128xi1>, vector<8x128xf32>
    %129 = vector.extract_strided_slice %128 {offsets = [0, 0], sizes = [8, 32], strides = [1, 1]} : vector<8x128xf32> to vector<8x32xf32>
    %130 = vector.extract_strided_slice %128 {offsets = [0, 32], sizes = [8, 32], strides = [1, 1]} : vector<8x128xf32> to vector<8x32xf32>
    %131 = vector.extract_strided_slice %128 {offsets = [0, 64], sizes = [8, 32], strides = [1, 1]} : vector<8x128xf32> to vector<8x32xf32>
    %132 = vector.extract_strided_slice %128 {offsets = [0, 96], sizes = [8, 32], strides = [1, 1]} : vector<8x128xf32> to vector<8x32xf32>
    %133 = arith.mulf %130, %92 : vector<8x32xf32>
    %134 = arith.mulf %129, %131 : vector<8x32xf32>
    %135 = arith.addf %133, %134 : vector<8x32xf32>
    %136 = math.tanh %135 : vector<8x32xf32>
    %137 = arith.mulf %132, %136 : vector<8x32xf32>
    %138 = vector.extract_strided_slice %12 {offsets = [24, 0], sizes = [8, 128], strides = [1, 1]} : vector<64x128xf32> to vector<8x128xf32>
    %cst_39 = arith.constant dense<0.000000e+00> : vector<8x128xf32>
    %139 = tpu.matmul %115, %0, %cst_39 {dimension_numbers = #tpu.dot_dimension_numbers<[1], [0], [0], [1], [0, 0, 1, 1], [], []>} : vector<8x32xf32>, vector<32x128xf32>, vector<8x128xf32> -> vector<8x128xf32>
    %140 = arith.addf %138, %139 : vector<8x128xf32>
    %cst_40 = arith.constant 5.000000e-01 : f32
    %141 = vector.broadcast %cst_40 : f32 to vector<8x128xf32>
    %142 = arith.mulf %141, %140 : vector<8x128xf32>
    %143 = arith.select %18, %140, %142 : vector<8x128xi1>, vector<8x128xf32>
    %144 = math.tanh %143 : vector<8x128xf32>
    %cst_41 = arith.constant 5.000000e-01 : f32
    %145 = vector.broadcast %cst_41 : f32 to vector<8x128xf32>
    %146 = arith.mulf %145, %144 : vector<8x128xf32>
    %cst_42 = arith.constant 5.000000e-01 : f32
    %147 = vector.broadcast %cst_42 : f32 to vector<8x128xf32>
    %148 = arith.addf %146, %147 : vector<8x128xf32>
    %149 = arith.select %18, %144, %148 : vector<8x128xi1>, vector<8x128xf32>
    %150 = vector.extract_strided_slice %149 {offsets = [0, 0], sizes = [8, 32], strides = [1, 1]} : vector<8x128xf32> to vector<8x32xf32>
    %151 = vector.extract_strided_slice %149 {offsets = [0, 32], sizes = [8, 32], strides = [1, 1]} : vector<8x128xf32> to vector<8x32xf32>
    %152 = vector.extract_strided_slice %149 {offsets = [0, 64], sizes = [8, 32], strides = [1, 1]} : vector<8x128xf32> to vector<8x32xf32>
    %153 = vector.extract_strided_slice %149 {offsets = [0, 96], sizes = [8, 32], strides = [1, 1]} : vector<8x128xf32> to vector<8x32xf32>
    %154 = arith.mulf %151, %113 : vector<8x32xf32>
    %155 = arith.mulf %150, %152 : vector<8x32xf32>
    %156 = arith.addf %154, %155 : vector<8x32xf32>
    %157 = math.tanh %156 : vector<8x32xf32>
    %158 = arith.mulf %153, %157 : vector<8x32xf32>
    %cst_43 = arith.constant dense<0.000000e+00> : vector<8x128xf32>
    %159 = tpu.matmul %158, %1, %cst_43 {dimension_numbers = #tpu.dot_dimension_numbers<[1], [0], [0], [1], [0, 0, 1, 1], [], []>} : vector<8x32xf32>, vector<32x128xf32>, vector<8x128xf32> -> vector<8x128xf32>
    %cst_44 = arith.constant dense<0.000000e+00> : vector<8x128xf32>
    %160 = tpu.matmul %137, %2, %cst_44 {dimension_numbers = #tpu.dot_dimension_numbers<[1], [0], [0], [1], [0, 0, 1, 1], [], []>} : vector<8x32xf32>, vector<32x128xf32>, vector<8x128xf32> -> vector<8x128xf32>
    %161 = arith.addf %159, %160 : vector<8x128xf32>
    %162 = arith.addf %161, %5 : vector<8x128xf32>
    %cst_45 = arith.constant 5.000000e-01 : f32
    %163 = vector.broadcast %cst_45 : f32 to vector<8x128xf32>
    %164 = arith.mulf %163, %162 : vector<8x128xf32>
    %165 = arith.select %18, %162, %164 : vector<8x128xi1>, vector<8x128xf32>
    %166 = math.tanh %165 : vector<8x128xf32>
    %cst_46 = arith.constant 5.000000e-01 : f32
    %167 = vector.broadcast %cst_46 : f32 to vector<8x128xf32>
    %168 = arith.mulf %167, %166 : vector<8x128xf32>
    %cst_47 = arith.constant 5.000000e-01 : f32
    %169 = vector.broadcast %cst_47 : f32 to vector<8x128xf32>
    %170 = arith.addf %168, %169 : vector<8x128xf32>
    %171 = arith.select %18, %166, %170 : vector<8x128xi1>, vector<8x128xf32>
    %172 = vector.extract_strided_slice %171 {offsets = [0, 0], sizes = [8, 32], strides = [1, 1]} : vector<8x128xf32> to vector<8x32xf32>
    %173 = vector.extract_strided_slice %171 {offsets = [0, 32], sizes = [8, 32], strides = [1, 1]} : vector<8x128xf32> to vector<8x32xf32>
    %174 = vector.extract_strided_slice %171 {offsets = [0, 64], sizes = [8, 32], strides = [1, 1]} : vector<8x128xf32> to vector<8x32xf32>
    %175 = vector.extract_strided_slice %171 {offsets = [0, 96], sizes = [8, 32], strides = [1, 1]} : vector<8x128xf32> to vector<8x32xf32>
    %176 = arith.mulf %173, %135 : vector<8x32xf32>
    %177 = arith.mulf %172, %174 : vector<8x32xf32>
    %178 = arith.addf %176, %177 : vector<8x32xf32>
    %179 = math.tanh %178 : vector<8x32xf32>
    %180 = arith.mulf %175, %179 : vector<8x32xf32>
    %181 = vector.extract_strided_slice %12 {offsets = [32, 0], sizes = [8, 128], strides = [1, 1]} : vector<64x128xf32> to vector<8x128xf32>
    %cst_48 = arith.constant dense<0.000000e+00> : vector<8x128xf32>
    %182 = tpu.matmul %158, %0, %cst_48 {dimension_numbers = #tpu.dot_dimension_numbers<[1], [0], [0], [1], [0, 0, 1, 1], [], []>} : vector<8x32xf32>, vector<32x128xf32>, vector<8x128xf32> -> vector<8x128xf32>
    %183 = arith.addf %181, %182 : vector<8x128xf32>
    %cst_49 = arith.constant 5.000000e-01 : f32
    %184 = vector.broadcast %cst_49 : f32 to vector<8x128xf32>
    %185 = arith.mulf %184, %183 : vector<8x128xf32>
    %186 = arith.select %18, %183, %185 : vector<8x128xi1>, vector<8x128xf32>
    %187 = math.tanh %186 : vector<8x128xf32>
    %cst_50 = arith.constant 5.000000e-01 : f32
    %188 = vector.broadcast %cst_50 : f32 to vector<8x128xf32>
    %189 = arith.mulf %188, %187 : vector<8x128xf32>
    %cst_51 = arith.constant 5.000000e-01 : f32
    %190 = vector.broadcast %cst_51 : f32 to vector<8x128xf32>
    %191 = arith.addf %189, %190 : vector<8x128xf32>
    %192 = arith.select %18, %187, %191 : vector<8x128xi1>, vector<8x128xf32>
    %193 = vector.extract_strided_slice %192 {offsets = [0, 0], sizes = [8, 32], strides = [1, 1]} : vector<8x128xf32> to vector<8x32xf32>
    %194 = vector.extract_strided_slice %192 {offsets = [0, 32], sizes = [8, 32], strides = [1, 1]} : vector<8x128xf32> to vector<8x32xf32>
    %195 = vector.extract_strided_slice %192 {offsets = [0, 64], sizes = [8, 32], strides = [1, 1]} : vector<8x128xf32> to vector<8x32xf32>
    %196 = vector.extract_strided_slice %192 {offsets = [0, 96], sizes = [8, 32], strides = [1, 1]} : vector<8x128xf32> to vector<8x32xf32>
    %197 = arith.mulf %194, %156 : vector<8x32xf32>
    %198 = arith.mulf %193, %195 : vector<8x32xf32>
    %199 = arith.addf %197, %198 : vector<8x32xf32>
    %200 = math.tanh %199 : vector<8x32xf32>
    %201 = arith.mulf %196, %200 : vector<8x32xf32>
    %cst_52 = arith.constant dense<0.000000e+00> : vector<8x128xf32>
    %202 = tpu.matmul %201, %1, %cst_52 {dimension_numbers = #tpu.dot_dimension_numbers<[1], [0], [0], [1], [0, 0, 1, 1], [], []>} : vector<8x32xf32>, vector<32x128xf32>, vector<8x128xf32> -> vector<8x128xf32>
    %cst_53 = arith.constant dense<0.000000e+00> : vector<8x128xf32>
    %203 = tpu.matmul %180, %2, %cst_53 {dimension_numbers = #tpu.dot_dimension_numbers<[1], [0], [0], [1], [0, 0, 1, 1], [], []>} : vector<8x32xf32>, vector<32x128xf32>, vector<8x128xf32> -> vector<8x128xf32>
    %204 = arith.addf %202, %203 : vector<8x128xf32>
    %205 = arith.addf %204, %5 : vector<8x128xf32>
    %cst_54 = arith.constant 5.000000e-01 : f32
    %206 = vector.broadcast %cst_54 : f32 to vector<8x128xf32>
    %207 = arith.mulf %206, %205 : vector<8x128xf32>
    %208 = arith.select %18, %205, %207 : vector<8x128xi1>, vector<8x128xf32>
    %209 = math.tanh %208 : vector<8x128xf32>
    %cst_55 = arith.constant 5.000000e-01 : f32
    %210 = vector.broadcast %cst_55 : f32 to vector<8x128xf32>
    %211 = arith.mulf %210, %209 : vector<8x128xf32>
    %cst_56 = arith.constant 5.000000e-01 : f32
    %212 = vector.broadcast %cst_56 : f32 to vector<8x128xf32>
    %213 = arith.addf %211, %212 : vector<8x128xf32>
    %214 = arith.select %18, %209, %213 : vector<8x128xi1>, vector<8x128xf32>
    %215 = vector.extract_strided_slice %214 {offsets = [0, 0], sizes = [8, 32], strides = [1, 1]} : vector<8x128xf32> to vector<8x32xf32>
    %216 = vector.extract_strided_slice %214 {offsets = [0, 32], sizes = [8, 32], strides = [1, 1]} : vector<8x128xf32> to vector<8x32xf32>
    %217 = vector.extract_strided_slice %214 {offsets = [0, 64], sizes = [8, 32], strides = [1, 1]} : vector<8x128xf32> to vector<8x32xf32>
    %218 = vector.extract_strided_slice %214 {offsets = [0, 96], sizes = [8, 32], strides = [1, 1]} : vector<8x128xf32> to vector<8x32xf32>
    %219 = arith.mulf %216, %178 : vector<8x32xf32>
    %220 = arith.mulf %215, %217 : vector<8x32xf32>
    %221 = arith.addf %219, %220 : vector<8x32xf32>
    %222 = math.tanh %221 : vector<8x32xf32>
    %223 = arith.mulf %218, %222 : vector<8x32xf32>
    %224 = vector.extract_strided_slice %12 {offsets = [40, 0], sizes = [8, 128], strides = [1, 1]} : vector<64x128xf32> to vector<8x128xf32>
    %cst_57 = arith.constant dense<0.000000e+00> : vector<8x128xf32>
    %225 = tpu.matmul %201, %0, %cst_57 {dimension_numbers = #tpu.dot_dimension_numbers<[1], [0], [0], [1], [0, 0, 1, 1], [], []>} : vector<8x32xf32>, vector<32x128xf32>, vector<8x128xf32> -> vector<8x128xf32>
    %226 = arith.addf %224, %225 : vector<8x128xf32>
    %cst_58 = arith.constant 5.000000e-01 : f32
    %227 = vector.broadcast %cst_58 : f32 to vector<8x128xf32>
    %228 = arith.mulf %227, %226 : vector<8x128xf32>
    %229 = arith.select %18, %226, %228 : vector<8x128xi1>, vector<8x128xf32>
    %230 = math.tanh %229 : vector<8x128xf32>
    %cst_59 = arith.constant 5.000000e-01 : f32
    %231 = vector.broadcast %cst_59 : f32 to vector<8x128xf32>
    %232 = arith.mulf %231, %230 : vector<8x128xf32>
    %cst_60 = arith.constant 5.000000e-01 : f32
    %233 = vector.broadcast %cst_60 : f32 to vector<8x128xf32>
    %234 = arith.addf %232, %233 : vector<8x128xf32>
    %235 = arith.select %18, %230, %234 : vector<8x128xi1>, vector<8x128xf32>
    %236 = vector.extract_strided_slice %235 {offsets = [0, 0], sizes = [8, 32], strides = [1, 1]} : vector<8x128xf32> to vector<8x32xf32>
    %237 = vector.extract_strided_slice %235 {offsets = [0, 32], sizes = [8, 32], strides = [1, 1]} : vector<8x128xf32> to vector<8x32xf32>
    %238 = vector.extract_strided_slice %235 {offsets = [0, 64], sizes = [8, 32], strides = [1, 1]} : vector<8x128xf32> to vector<8x32xf32>
    %239 = vector.extract_strided_slice %235 {offsets = [0, 96], sizes = [8, 32], strides = [1, 1]} : vector<8x128xf32> to vector<8x32xf32>
    %240 = arith.mulf %237, %199 : vector<8x32xf32>
    %241 = arith.mulf %236, %238 : vector<8x32xf32>
    %242 = arith.addf %240, %241 : vector<8x32xf32>
    %243 = math.tanh %242 : vector<8x32xf32>
    %244 = arith.mulf %239, %243 : vector<8x32xf32>
    %cst_61 = arith.constant dense<0.000000e+00> : vector<8x128xf32>
    %245 = tpu.matmul %244, %1, %cst_61 {dimension_numbers = #tpu.dot_dimension_numbers<[1], [0], [0], [1], [0, 0, 1, 1], [], []>} : vector<8x32xf32>, vector<32x128xf32>, vector<8x128xf32> -> vector<8x128xf32>
    %cst_62 = arith.constant dense<0.000000e+00> : vector<8x128xf32>
    %246 = tpu.matmul %223, %2, %cst_62 {dimension_numbers = #tpu.dot_dimension_numbers<[1], [0], [0], [1], [0, 0, 1, 1], [], []>} : vector<8x32xf32>, vector<32x128xf32>, vector<8x128xf32> -> vector<8x128xf32>
    %247 = arith.addf %245, %246 : vector<8x128xf32>
    %248 = arith.addf %247, %5 : vector<8x128xf32>
    %cst_63 = arith.constant 5.000000e-01 : f32
    %249 = vector.broadcast %cst_63 : f32 to vector<8x128xf32>
    %250 = arith.mulf %249, %248 : vector<8x128xf32>
    %251 = arith.select %18, %248, %250 : vector<8x128xi1>, vector<8x128xf32>
    %252 = math.tanh %251 : vector<8x128xf32>
    %cst_64 = arith.constant 5.000000e-01 : f32
    %253 = vector.broadcast %cst_64 : f32 to vector<8x128xf32>
    %254 = arith.mulf %253, %252 : vector<8x128xf32>
    %cst_65 = arith.constant 5.000000e-01 : f32
    %255 = vector.broadcast %cst_65 : f32 to vector<8x128xf32>
    %256 = arith.addf %254, %255 : vector<8x128xf32>
    %257 = arith.select %18, %252, %256 : vector<8x128xi1>, vector<8x128xf32>
    %258 = vector.extract_strided_slice %257 {offsets = [0, 0], sizes = [8, 32], strides = [1, 1]} : vector<8x128xf32> to vector<8x32xf32>
    %259 = vector.extract_strided_slice %257 {offsets = [0, 32], sizes = [8, 32], strides = [1, 1]} : vector<8x128xf32> to vector<8x32xf32>
    %260 = vector.extract_strided_slice %257 {offsets = [0, 64], sizes = [8, 32], strides = [1, 1]} : vector<8x128xf32> to vector<8x32xf32>
    %261 = vector.extract_strided_slice %257 {offsets = [0, 96], sizes = [8, 32], strides = [1, 1]} : vector<8x128xf32> to vector<8x32xf32>
    %262 = arith.mulf %259, %221 : vector<8x32xf32>
    %263 = arith.mulf %258, %260 : vector<8x32xf32>
    %264 = arith.addf %262, %263 : vector<8x32xf32>
    %265 = math.tanh %264 : vector<8x32xf32>
    %266 = arith.mulf %261, %265 : vector<8x32xf32>
    %267 = vector.extract_strided_slice %12 {offsets = [48, 0], sizes = [8, 128], strides = [1, 1]} : vector<64x128xf32> to vector<8x128xf32>
    %cst_66 = arith.constant dense<0.000000e+00> : vector<8x128xf32>
    %268 = tpu.matmul %244, %0, %cst_66 {dimension_numbers = #tpu.dot_dimension_numbers<[1], [0], [0], [1], [0, 0, 1, 1], [], []>} : vector<8x32xf32>, vector<32x128xf32>, vector<8x128xf32> -> vector<8x128xf32>
    %269 = arith.addf %267, %268 : vector<8x128xf32>
    %cst_67 = arith.constant 5.000000e-01 : f32
    %270 = vector.broadcast %cst_67 : f32 to vector<8x128xf32>
    %271 = arith.mulf %270, %269 : vector<8x128xf32>
    %272 = arith.select %18, %269, %271 : vector<8x128xi1>, vector<8x128xf32>
    %273 = math.tanh %272 : vector<8x128xf32>
    %cst_68 = arith.constant 5.000000e-01 : f32
    %274 = vector.broadcast %cst_68 : f32 to vector<8x128xf32>
    %275 = arith.mulf %274, %273 : vector<8x128xf32>
    %cst_69 = arith.constant 5.000000e-01 : f32
    %276 = vector.broadcast %cst_69 : f32 to vector<8x128xf32>
    %277 = arith.addf %275, %276 : vector<8x128xf32>
    %278 = arith.select %18, %273, %277 : vector<8x128xi1>, vector<8x128xf32>
    %279 = vector.extract_strided_slice %278 {offsets = [0, 0], sizes = [8, 32], strides = [1, 1]} : vector<8x128xf32> to vector<8x32xf32>
    %280 = vector.extract_strided_slice %278 {offsets = [0, 32], sizes = [8, 32], strides = [1, 1]} : vector<8x128xf32> to vector<8x32xf32>
    %281 = vector.extract_strided_slice %278 {offsets = [0, 64], sizes = [8, 32], strides = [1, 1]} : vector<8x128xf32> to vector<8x32xf32>
    %282 = vector.extract_strided_slice %278 {offsets = [0, 96], sizes = [8, 32], strides = [1, 1]} : vector<8x128xf32> to vector<8x32xf32>
    %283 = arith.mulf %280, %242 : vector<8x32xf32>
    %284 = arith.mulf %279, %281 : vector<8x32xf32>
    %285 = arith.addf %283, %284 : vector<8x32xf32>
    %286 = math.tanh %285 : vector<8x32xf32>
    %287 = arith.mulf %282, %286 : vector<8x32xf32>
    %cst_70 = arith.constant dense<0.000000e+00> : vector<8x128xf32>
    %288 = tpu.matmul %287, %1, %cst_70 {dimension_numbers = #tpu.dot_dimension_numbers<[1], [0], [0], [1], [0, 0, 1, 1], [], []>} : vector<8x32xf32>, vector<32x128xf32>, vector<8x128xf32> -> vector<8x128xf32>
    %cst_71 = arith.constant dense<0.000000e+00> : vector<8x128xf32>
    %289 = tpu.matmul %266, %2, %cst_71 {dimension_numbers = #tpu.dot_dimension_numbers<[1], [0], [0], [1], [0, 0, 1, 1], [], []>} : vector<8x32xf32>, vector<32x128xf32>, vector<8x128xf32> -> vector<8x128xf32>
    %290 = arith.addf %288, %289 : vector<8x128xf32>
    %291 = arith.addf %290, %5 : vector<8x128xf32>
    %cst_72 = arith.constant 5.000000e-01 : f32
    %292 = vector.broadcast %cst_72 : f32 to vector<8x128xf32>
    %293 = arith.mulf %292, %291 : vector<8x128xf32>
    %294 = arith.select %18, %291, %293 : vector<8x128xi1>, vector<8x128xf32>
    %295 = math.tanh %294 : vector<8x128xf32>
    %cst_73 = arith.constant 5.000000e-01 : f32
    %296 = vector.broadcast %cst_73 : f32 to vector<8x128xf32>
    %297 = arith.mulf %296, %295 : vector<8x128xf32>
    %cst_74 = arith.constant 5.000000e-01 : f32
    %298 = vector.broadcast %cst_74 : f32 to vector<8x128xf32>
    %299 = arith.addf %297, %298 : vector<8x128xf32>
    %300 = arith.select %18, %295, %299 : vector<8x128xi1>, vector<8x128xf32>
    %301 = vector.extract_strided_slice %300 {offsets = [0, 0], sizes = [8, 32], strides = [1, 1]} : vector<8x128xf32> to vector<8x32xf32>
    %302 = vector.extract_strided_slice %300 {offsets = [0, 32], sizes = [8, 32], strides = [1, 1]} : vector<8x128xf32> to vector<8x32xf32>
    %303 = vector.extract_strided_slice %300 {offsets = [0, 64], sizes = [8, 32], strides = [1, 1]} : vector<8x128xf32> to vector<8x32xf32>
    %304 = vector.extract_strided_slice %300 {offsets = [0, 96], sizes = [8, 32], strides = [1, 1]} : vector<8x128xf32> to vector<8x32xf32>
    %305 = arith.mulf %302, %264 : vector<8x32xf32>
    %306 = arith.mulf %301, %303 : vector<8x32xf32>
    %307 = arith.addf %305, %306 : vector<8x32xf32>
    %308 = math.tanh %307 : vector<8x32xf32>
    %309 = arith.mulf %304, %308 : vector<8x32xf32>
    %310 = vector.extract_strided_slice %12 {offsets = [56, 0], sizes = [8, 128], strides = [1, 1]} : vector<64x128xf32> to vector<8x128xf32>
    %cst_75 = arith.constant dense<0.000000e+00> : vector<8x128xf32>
    %311 = tpu.matmul %287, %0, %cst_75 {dimension_numbers = #tpu.dot_dimension_numbers<[1], [0], [0], [1], [0, 0, 1, 1], [], []>} : vector<8x32xf32>, vector<32x128xf32>, vector<8x128xf32> -> vector<8x128xf32>
    %312 = arith.addf %310, %311 : vector<8x128xf32>
    %cst_76 = arith.constant 5.000000e-01 : f32
    %313 = vector.broadcast %cst_76 : f32 to vector<8x128xf32>
    %314 = arith.mulf %313, %312 : vector<8x128xf32>
    %315 = arith.select %18, %312, %314 : vector<8x128xi1>, vector<8x128xf32>
    %316 = math.tanh %315 : vector<8x128xf32>
    %cst_77 = arith.constant 5.000000e-01 : f32
    %317 = vector.broadcast %cst_77 : f32 to vector<8x128xf32>
    %318 = arith.mulf %317, %316 : vector<8x128xf32>
    %cst_78 = arith.constant 5.000000e-01 : f32
    %319 = vector.broadcast %cst_78 : f32 to vector<8x128xf32>
    %320 = arith.addf %318, %319 : vector<8x128xf32>
    %321 = arith.select %18, %316, %320 : vector<8x128xi1>, vector<8x128xf32>
    %322 = vector.extract_strided_slice %321 {offsets = [0, 0], sizes = [8, 32], strides = [1, 1]} : vector<8x128xf32> to vector<8x32xf32>
    %323 = vector.extract_strided_slice %321 {offsets = [0, 32], sizes = [8, 32], strides = [1, 1]} : vector<8x128xf32> to vector<8x32xf32>
    %324 = vector.extract_strided_slice %321 {offsets = [0, 64], sizes = [8, 32], strides = [1, 1]} : vector<8x128xf32> to vector<8x32xf32>
    %325 = vector.extract_strided_slice %321 {offsets = [0, 96], sizes = [8, 32], strides = [1, 1]} : vector<8x128xf32> to vector<8x32xf32>
    %326 = arith.mulf %323, %285 : vector<8x32xf32>
    %327 = arith.mulf %322, %324 : vector<8x32xf32>
    %328 = arith.addf %326, %327 : vector<8x32xf32>
    %329 = math.tanh %328 : vector<8x32xf32>
    %330 = arith.mulf %325, %329 : vector<8x32xf32>
    %cst_79 = arith.constant dense<0.000000e+00> : vector<8x128xf32>
    %331 = tpu.matmul %330, %1, %cst_79 {dimension_numbers = #tpu.dot_dimension_numbers<[1], [0], [0], [1], [0, 0, 1, 1], [], []>} : vector<8x32xf32>, vector<32x128xf32>, vector<8x128xf32> -> vector<8x128xf32>
    %cst_80 = arith.constant dense<0.000000e+00> : vector<8x128xf32>
    %332 = tpu.matmul %309, %2, %cst_80 {dimension_numbers = #tpu.dot_dimension_numbers<[1], [0], [0], [1], [0, 0, 1, 1], [], []>} : vector<8x32xf32>, vector<32x128xf32>, vector<8x128xf32> -> vector<8x128xf32>
    %333 = arith.addf %331, %332 : vector<8x128xf32>
    %334 = arith.addf %333, %5 : vector<8x128xf32>
    %cst_81 = arith.constant 5.000000e-01 : f32
    %335 = vector.broadcast %cst_81 : f32 to vector<8x128xf32>
    %336 = arith.mulf %335, %334 : vector<8x128xf32>
    %337 = arith.select %18, %334, %336 : vector<8x128xi1>, vector<8x128xf32>
    %338 = math.tanh %337 : vector<8x128xf32>
    %cst_82 = arith.constant 5.000000e-01 : f32
    %339 = vector.broadcast %cst_82 : f32 to vector<8x128xf32>
    %340 = arith.mulf %339, %338 : vector<8x128xf32>
    %cst_83 = arith.constant 5.000000e-01 : f32
    %341 = vector.broadcast %cst_83 : f32 to vector<8x128xf32>
    %342 = arith.addf %340, %341 : vector<8x128xf32>
    %343 = arith.select %18, %338, %342 : vector<8x128xi1>, vector<8x128xf32>
    %344 = vector.extract_strided_slice %343 {offsets = [0, 0], sizes = [8, 32], strides = [1, 1]} : vector<8x128xf32> to vector<8x32xf32>
    %345 = vector.extract_strided_slice %343 {offsets = [0, 32], sizes = [8, 32], strides = [1, 1]} : vector<8x128xf32> to vector<8x32xf32>
    %346 = vector.extract_strided_slice %343 {offsets = [0, 64], sizes = [8, 32], strides = [1, 1]} : vector<8x128xf32> to vector<8x32xf32>
    %347 = vector.extract_strided_slice %343 {offsets = [0, 96], sizes = [8, 32], strides = [1, 1]} : vector<8x128xf32> to vector<8x32xf32>
    %348 = arith.mulf %345, %307 : vector<8x32xf32>
    %349 = arith.mulf %344, %346 : vector<8x32xf32>
    %350 = arith.addf %348, %349 : vector<8x32xf32>
    %351 = math.tanh %350 : vector<8x32xf32>
    %352 = arith.mulf %347, %351 : vector<8x32xf32>
    %c0_84 = arith.constant 0 : index
    %c0_85 = arith.constant 0 : index
    %353 = vector.load %arg8[%c0_84, %c0_85] : memref<32x4xf32, #tpu.memory_space<vmem>>, vector<32x4xf32>
    %cst_86 = arith.constant dense<0.000000e+00> : vector<8x4xf32>
    %354 = tpu.matmul %352, %353, %cst_86 {dimension_numbers = #tpu.dot_dimension_numbers<[1], [0], [0], [1], [0, 0, 1, 1], [], []>} : vector<8x32xf32>, vector<32x4xf32>, vector<8x4xf32> -> vector<8x4xf32>
    %c0_87 = arith.constant 0 : index
    %c0_88 = arith.constant 0 : index
    %355 = vector.load %arg9[%c0_87, %c0_88] : memref<1x4xf32, #tpu.memory_space<vmem>>, vector<1x4xf32>
    %356 = vector.broadcast %355 : vector<1x4xf32> to vector<8x4xf32>
    %357 = arith.addf %354, %356 : vector<8x4xf32>
    %c0_89 = arith.constant 0 : index
    %c0_90 = arith.constant 0 : index
    %358 = vector.load %arg10[%c0_89, %c0_90] : memref<8x4xf32, #tpu.memory_space<vmem>>, vector<8x4xf32>
    tpu.vector_store %arg10[%c0_89, %c0_90], %357 {strides = array<i32>} : memref<8x4xf32, #tpu.memory_space<vmem>>, vector<8x4xf32>,
    return
  }
  func.func @transform_0(%arg0: i32) -> (i32, i32, i32) {
    %c0_i32 = arith.constant 0 : i32
    %c0_i32_0 = arith.constant 0 : i32
    %c0_i32_1 = arith.constant 0 : i32
    return %c0_i32, %arg0, %c0_i32_0 : i32, i32, i32
  }
  func.func @transform_1(%arg0: i32) -> (i32, i32) {
    %c0_i32 = arith.constant 0 : i32
    %c0_i32_0 = arith.constant 0 : i32
    %c0_i32_1 = arith.constant 0 : i32
    return %c0_i32, %c0_i32_0 : i32, i32
  }
  func.func @transform_2(%arg0: i32) -> (i32, i32) {
    %c0_i32 = arith.constant 0 : i32
    %c0_i32_0 = arith.constant 0 : i32
    %c0_i32_1 = arith.constant 0 : i32
    return %c0_i32, %c0_i32_0 : i32, i32
  }
  func.func @transform_3(%arg0: i32) -> (i32, i32) {
    %c0_i32 = arith.constant 0 : i32
    %c0_i32_0 = arith.constant 0 : i32
    %c0_i32_1 = arith.constant 0 : i32
    return %c0_i32, %c0_i32_0 : i32, i32
  }
  func.func @transform_4(%arg0: i32) -> (i32, i32) {
    %c0_i32 = arith.constant 0 : i32
    %c0_i32_0 = arith.constant 0 : i32
    %c0_i32_1 = arith.constant 0 : i32
    return %c0_i32, %c0_i32_0 : i32, i32
  }
  func.func @transform_5(%arg0: i32) -> (i32, i32) {
    %c0_i32 = arith.constant 0 : i32
    %c0_i32_0 = arith.constant 0 : i32
    %c0_i32_1 = arith.constant 0 : i32
    return %c0_i32, %c0_i32_0 : i32, i32
  }
  func.func @transform_6(%arg0: i32) -> (i32, i32) {
    %c0_i32 = arith.constant 0 : i32
    %c0_i32_0 = arith.constant 0 : i32
    %c0_i32_1 = arith.constant 0 : i32
    return %c0_i32, %c0_i32_0 : i32, i32
  }
  func.func @transform_7(%arg0: i32) -> (i32, i32) {
    %c0_i32 = arith.constant 0 : i32
    %c0_i32_0 = arith.constant 0 : i32
    %c0_i32_1 = arith.constant 0 : i32
    return %c0_i32, %c0_i32_0 : i32, i32
  }
  func.func @transform_8(%arg0: i32) -> (i32, i32) {
    %c0_i32 = arith.constant 0 : i32
    %c0_i32_0 = arith.constant 0 : i32
    %c0_i32_1 = arith.constant 0 : i32
    return %c0_i32, %c0_i32_0 : i32, i32
  }
  func.func @transform_9(%arg0: i32) -> (i32, i32) {
    %c0_i32 = arith.constant 0 : i32
    %c0_i32_0 = arith.constant 0 : i32
    return %arg0, %c0_i32 : i32, i32
  }
}

</mosaic_0001>

<bundles_post_ra>
// kernel: tpu_custom_call.1
= control target key start
LH: loop header
LB: loop body
LE: loop exit
PB: predicated region body
PF: predicated region fallthrough
CT: control target
= control target key end

     0   :  { %14 = vsyncpa [#allocation3], 0  ;;  %s1771_s0 = inlined_call_operand.hbm [shape: f32[8,8,16], index: 0, kind: input, shape index: {}]   ;;  %s1772_s1 = inlined_call_operand.hbm [shape: f32[16,128], index: 1, kind: input, shape index: {}]   ;;  %s1773_s2 = inlined_call_operand.vmem [shape: f32[32,128], index: 2, kind: input, shape index: {}]   ;;  %s1774_s3 = inlined_call_operand.vmem [shape: f32[1,128], index: 3, kind: input, shape index: {}]   ;;  %s1775_s4 = inlined_call_operand.hbm [shape: f32[32,128], index: 4, kind: input, shape index: {}]   ;;  %s1776_s5 = inlined_call_operand.hbm [shape: f32[32,128], index: 5, kind: input, shape index: {}]   ;;  %s1777_s6 = inlined_call_operand.vmem [shape: f32[1,128], index: 6, kind: input, shape index: {}]   ;;  %s1778_s7 = inlined_call_operand.vmem [shape: f32[32,4], index: 7, kind: input, shape index: {}]   ;;  %s1779_s8 = inlined_call_operand.vmem [shape: f32[1,4], index: 8, kind: input, shape index: {}]   ;;  %s1780_s9 = inlined_call_operand.vmem [shape: f32[8,4], index: 9, kind: output, shape index: {}]  }
   0x1   :  { %15 = vsyncpa [#allocation5], 0 }
   0x2   :  { %16 = vsyncpa [#allocation8], 0  ;;  %s34_s11 = sshll.u32 %s1772_s1, 4  ;;  %s1341_s12 = smov [#allocation4]   ;;  %s35_s11 = int_to_ptr.hbm [resolvable:$true] %s34_s11 }
   0x3   :  { %s36_s13 = sshll.u32 %s1341_s12, 4  ;;  %s21_s16 = sshll.u32 %s1771_s0, 4  ;;  %s37_s13 = int_to_ptr.vmem [resolvable:$true] %s36_s13  ;;  %s22_s16 = int_to_ptr.hbm [resolvable:$true] %s21_s16 }
   0x4   :  { %s1342_s17 = smov 128   ;;  %s1343_s18 = smov 8  }
   0x5   :  { %42 = dma.hbm_to_vmem [thread:$0]  %s35_s11, 256, %s37_s13, [#allocation5], %s1342_s17, %s1342_s17, %s1343_s18  }
   0x6   :  { %s1344_s19 = smov [#allocation2]   ;;  %s51_s23 = sshll.u32 %s1775_s4, 4  ;;  %s52_s23 = int_to_ptr.hbm [resolvable:$true] %s51_s23 }
   0x7   :  { %s23_s20 = sshll.u32 %s1344_s19, 4  ;;  %s64_s25 = sshll.u32 %s1776_s5, 4  ;;  %s24_s20 = int_to_ptr.vmem [resolvable:$true] %s23_s20  ;;  %s65_s25 = int_to_ptr.hbm [resolvable:$true] %s64_s25 }
   0x8   :  { %29 = dma.hbm_to_vmem [thread:$0]  %s22_s16, 1024, %s24_s20, [#allocation3], %s1342_s17, %s1342_s17, %s1343_s18  }
   0x9   :  { %s1345_s26 = smov [#allocation6]   ;;  %s1346_s0 = smov [#allocation7]  }
   0xa   :  { %s53_s27 = sshll.u32 %s1345_s26, 4  ;;  %s66_s28 = sshll.u32 %s1346_s0, 4  ;;  %s54_s27 = int_to_ptr.vmem [resolvable:$true] %s53_s27  ;;  %s67_s28 = int_to_ptr.vmem [resolvable:$true] %s66_s28 }
   0xb   :  { %59 = dma.hbm_to_vmem [thread:$0]  %s52_s23, 512, %s54_s27, [#allocation5], %s1342_s17, %s1342_s17, %s1343_s18  }
   0xc   :  { %72 = dma.hbm_to_vmem [thread:$0]  %s65_s25, 512, %s67_s28, [#allocation8], %s1342_s17, %s1342_s17, %s1343_s18  }
   0xd   :  { %1335 = dma.done.wait [#allocation3], 1024  }
   0xe   :  { %1336 = vsyncadd [#allocation3], 4294966272 }
   0xf   :  { %1337 = dma.done.wait [#allocation5], 768  }
  0x10   :  { %1338 = vsyncadd [#allocation5], 4294966528 }
  0x11   :  { %1339 = dma.done.wait [#allocation8], 512  }
  0x12   :  { %1340 = vsyncadd [#allocation8], 4294966784  ;;  %v120_v0 = vld [vmem:[#allocation4 + $0x8] sm:$0xff]  ;;  %v119_v1 = vld [vmem:[#allocation4] sm:$0xff]  ;;  %vm125_vm0 = vcmask 130048   ;;  %v191_v3 = vlaneseq  ;;  %s1348_s29 = smov 96  }
  0x13   :  { %164 = vmatpush.msra.mxu0 %v120_v0  ;;  %v111_v2 = vld [vmem:[#allocation2] sm:$0xff]  ;;  %v1432_v18 = vld [vmem:[#allocation6 + $0x18] sm:$0xff]  ;;  %v1437_v19 = vld [vmem:[%s1773_s2 + $0x18] sm:$0xff]  ;;  %s1349_s15 = smov 32   ;;  %vm216_vm4 = vcmask 261120   ;;  %vm1123_vm5 = vcmask 31744  }
  0x14   :  { %v192_v4 = vand.u32 127, %v191_v3  ;;  %v1416_v5 = vld [vmem:[%s1774_s3] ss:$0 sm:$0xff]  ;;  %s1347_s3 = smov 64   ;;  %231 = vmatpush.msra.mxu1 %v1432_v18  ;;  %268 = vmatpush.msra.mxu2 %v1437_v19  ;;  %v1446_v21 = vld [vmem:[%s1773_s2 + $0x10] sm:$0xff]  ;;  %v1448_v22 = vld [vmem:[#allocation6 + $0x8] sm:$0xff] }
  0x15   :  { %165 = vmatpush.msra.mxu0 %v119_v1  ;;  %v1439_v20 = vld [vmem:[#allocation6 + $0x10] sm:$0xff]  ;;  %v1453_v23 = vld [vmem:[%s1773_s2 + $0x8] sm:$0xff]  ;;  %v1460_v26 = vld [vmem:[#allocation6] sm:$0xff] }
  0x16   :  { %1132 = vmatmul.msk.f32.vlgmr.msra.gmra.mxu0 %vm125_vm0, %v111_v2  ;;  %vm193_vm1 = vcmp.ge.s32.totalorder %v192_v4, 64  ;;  %vm194_vm2 = vcmp.lt.s32.totalorder %v192_v4, 96  ;;  %232 = vmatpush.msra.mxu1 %v1439_v20  ;;  %v1465_v27 = vld [vmem:[%s1773_s2] sm:$0xff]  ;;  %v112_v28 = vld [vmem:[#allocation2 + $0x8] sm:$0xff]  ;;  %v1515_v58 = vld [vmem:[#allocation7 + $0x8] sm:$0xff] }
  0x17   :  { %vm1419_vm3 = vmand %vm193_vm1, %vm194_vm2  ;;  %269 = vmatpush.msra.mxu2 %v1446_v21  ;;  %v1491_v30 = vld [vmem:[%s1777_s6] ss:$0 sm:$0xff]  ;;  %v1509_v56 = vld [vmem:[#allocation7 + $0x18] sm:$0xff] }
  0x18   :  { %233 = vmatpush.msra.mxu1 %v1448_v22  ;;  %v1511_v57 = vld [vmem:[#allocation7 + $0x10] sm:$0xff]  ;;  %321 = vmatpush.msra.mxu3 %v1509_v56  ;;  %v1518_v59 = vld [vmem:[#allocation7] sm:$0xff] }
  0x19   :  { %270 = vmatpush.msra.mxu2 %v1453_v23  ;;  %v113_v4 = vld [vmem:[#allocation2 + $0x10] sm:$0xff] }
  0x1a   :  { %234 = vmatpush.msra.mxu1 %v1460_v26  ;;  %322 = vmatpush.msra.mxu3 %v1511_v57  ;;  %v1092_v8 = vld [vmem:[%s1778_s7 + $0x10] sm:$0xff] }
  0x1b   :  { %271 = vmatpush.msra.mxu2 %v1465_v27 }
  0x1c   :  { %346 = vmatpush.msrb.mxu1 %v1432_v18  ;;  %323 = vmatpush.msra.mxu3 %v1515_v58 }
  0x1d   :  { %394 = vmatpush.msrb.mxu2 %v1437_v19 }
  0x1e   :  { %1133 = vmatmul.msk.f32.gmra.mxu0 %vm125_vm0, %v112_v28  ;;  %347 = vmatpush.msrb.mxu1 %v1439_v20 }
  0x1f   :  { %395 = vmatpush.msrb.mxu2 %v1446_v21  ;;  %324 = vmatpush.msra.mxu3 %v1518_v59 }
  0x20   :  { %348 = vmatpush.msrb.mxu1 %v1448_v22 }
  0x21   :  { %396 = vmatpush.msrb.mxu2 %v1453_v23  ;;  %443 = vmatpush.msrb.mxu3 %v1509_v56 }
  0x22   :  { %349 = vmatpush.msrb.mxu1 %v1460_v26 }
  0x23   :  { %397 = vmatpush.msrb.mxu2 %v1465_v27  ;;  %444 = vmatpush.msrb.mxu3 %v1511_v57 }
  0x25   :  { %445 = vmatpush.msrb.mxu3 %v1515_v58 }
  0x26   :  { %1134 = vmatmul.msk.f32.gmra.mxu0 %vm125_vm0, %v113_v4 }
  0x27   :  { %446 = vmatpush.msrb.mxu3 %v1518_v59 }
  0x93   :  { %v167_v6 = vpop.f32.mrf.mxu0 }
  0x94   :  { %v168_v7 = vadd.f32 %v1416_v5, %v167_v6 }
  0x96   :  { %v196_v9 = vmul.f32 0.5, %v168_v7 }
  0x98   :  { %v197_v10 = vsel %vm1419_vm3, %v168_v7, %v196_v9 }
  0x99   :  { %1175 = vtanh.f32 %v197_v10 }
  0x9b   :  { %v170_v32 = vpop.f32.mrf.mxu0 }
  0x9c   :  { %v171_v35 = vadd.f32 %v1416_v5, %v170_v32 }
  0x9f   :  { %v1176_v11 = vpop.eup %1175 }
  0xa0   :  { %v199_v12 = vmul.f32 0.5, %v1176_v11 }
  0xa2   :  { %v200_v13 = vadd.f32 0.5, %v199_v12 }
  0xa3   :  { %v173_v10 = vpop.f32.mrf.mxu0 }
  0xa4   :  { %v201_v14 = vsel %vm1419_vm3, %v1176_v11, %v200_v13  ;;  %v174_v13 = vadd.f32 %v1416_v5, %v173_v10 }
  0xa5   :  { %203 = vrot.lane.b32.xlu0 %v201_v14, %s1347_s3 }
 0x117   :  { %v204_v15 = vpop.permute.xlu0 %203 }
 0x118   :  { %v1428_v16 = vmul.f32 %v204_v15, %v201_v14 }
 0x11a   :  { %1177 = vtanh.f32 %v1428_v16 }
 0x120   :  { %v1178_v17 = vpop.eup %1177 }
 0x121   :  { %209 = vrot.lane.b32.xlu0 %v1178_v17, %s1348_s29 }
 0x193   :  { %v210_v24 = vpop.permute.xlu0 %209 }
 0x194   :  { %v212_v25 = vmul.f32 %v210_v24, %v201_v14 }
 0x196   :  { %214 = vrot.lane.b32.xlu1 %v212_v25, %s1349_s15 }
 0x208   :  { %v215_v29 = vpop.permute.xlu1 %214 }
 0x209   :  { %1140 = vmatmul.msk.f32.vlgmr.msra.gmra.mxu1 %vm216_vm4, %v215_v29  ;;  %1141 = vmatmul.msk.f32.vlgmr.msra.gmra.mxu2 %vm216_vm4, %v215_v29 }
 0x20a   :  { %512 = vmatpush.msra.mxu2 %v1437_v19  ;;  %468 = vmatpush.msra.mxu1 %v1432_v18 }
 0x20c   :  { %513 = vmatpush.msra.mxu2 %v1446_v21  ;;  %469 = vmatpush.msra.mxu1 %v1439_v20 }
 0x20e   :  { %514 = vmatpush.msra.mxu2 %v1453_v23  ;;  %470 = vmatpush.msra.mxu1 %v1448_v22 }
 0x210   :  { %515 = vmatpush.msra.mxu2 %v1465_v27  ;;  %471 = vmatpush.msra.mxu1 %v1460_v26 }
 0x286   :  { %v236_v31 = vpop.f32.mrf.mxu1 }
 0x287   :  { %v237_v33 = vadd.f32 %v1491_v30, %v236_v31 }
 0x289   :  { %v239_v34 = vmul.f32 0.5, %v237_v33 }
 0x28b   :  { %v240_v36 = vsel %vm1419_vm3, %v237_v33, %v239_v34 }
 0x28c   :  { %1179 = vtanh.f32 %v240_v36  ;;  %v273_v37 = vpop.f32.mrf.mxu2 }
 0x28d   :  { %v276_v38 = vadd.f32 %v273_v37, %v171_v35 }
 0x28f   :  { %v277_v39 = vmul.f32 0.5, %v276_v38 }
 0x291   :  { %v278_v40 = vsel %vm1419_vm3, %v276_v38, %v277_v39 }
 0x292   :  { %v1180_v41 = vpop.eup %1179  ;;  %1181 = vtanh.f32 %v278_v40 }
 0x293   :  { %v242_v42 = vmul.f32 0.5, %v1180_v41 }
 0x295   :  { %v243_v43 = vadd.f32 0.5, %v242_v42 }
 0x297   :  { %v244_v44 = vsel %vm1419_vm3, %v1180_v41, %v243_v43 }
 0x298   :  { %v1182_v45 = vpop.eup %1181  ;;  %246 = vrot.lane.b32.xlu2 %v244_v44, %s1347_s3 }
 0x299   :  { %v280_v46 = vmul.f32 0.5, %v1182_v45 }
 0x29b   :  { %v281_v47 = vadd.f32 0.5, %v280_v46 }
 0x29d   :  { %v282_v48 = vsel %vm1419_vm3, %v1182_v45, %v281_v47 }
 0x29e   :  { %289 = vrot.lane.b32.xlu1 %v282_v48, %s1347_s3 }
 0x2a0   :  { %284 = vrot.lane.b32.xlu2 %v1428_v16, %s1349_s15 }
 0x2f2   :  { %v247_v49 = vpop.permute.xlu2 %246 }
 0x2f3   :  { %v249_v50 = vmul.f32 %v247_v49, %v244_v44 }
 0x2f5   :  { %1183 = vtanh.f32 %v249_v50 }
 0x2fa   :  { %v285_v60 = vpop.permute.xlu2 %284 }
 0x2fb   :  { %v1184_v51 = vpop.eup %1183  ;;  %v287_v61 = vmul.f32 %v285_v60, %v282_v48 }
 0x2fc   :  { %252 = vrot.lane.b32.xlu1 %v1184_v51, %s1348_s29 }
 0x310   :  { %v290_v52 = vpop.permute.xlu1 %289 }
 0x311   :  { %v292_v53 = vmul.f32 %v290_v52, %v282_v48 }
 0x313   :  { %294 = vrot.lane.b32.xlu0 %v292_v53, %s1349_s15 }
 0x36e   :  { %v253_v54 = vpop.permute.xlu1 %252 }
 0x36f   :  { %v255_v55 = vmul.f32 %v253_v54, %v244_v44  ;;  %v114_v54 = vld [vmem:[#allocation2 + $0x18] sm:$0xff] }
 0x370   :  { %1135 = vmatmul.msk.f32.gmra.mxu0 %vm125_vm0, %v114_v54 }
 0x371   :  { %305 = vrot.lane.b32.xlu0 %v255_v55, %s1349_s15 }
 0x385   :  { %v295_v62 = vpop.permute.xlu0 %294 }
 0x386   :  { %v1526_v63 = vadd.f32 %v295_v62, %v287_v61 }
 0x388   :  { %1185 = vtanh.f32 %v1526_v63 }
 0x38e   :  { %v1186_v0 = vpop.eup %1185 }
 0x38f   :  { %300 = vrot.lane.b32.xlu2 %v1186_v0, %s1347_s3 }
 0x3e3   :  { %v306_v1 = vpop.permute.xlu0 %305 }
 0x3e4   :  { %1142 = vmatmul.msk.f32.vlgmr.msra.gmra.mxu3 %vm216_vm4, %v306_v1 }
 0x3e5   :  { %561 = vmatpush.msra.mxu3 %v1509_v56 }
 0x3e7   :  { %562 = vmatpush.msra.mxu3 %v1511_v57 }
 0x3e9   :  { %v301_v2 = vpop.permute.xlu2 %300  ;;  %563 = vmatpush.msra.mxu3 %v1515_v58 }
 0x3ea   :  { %v303_v3 = vmul.f32 %v301_v2, %v282_v48 }
 0x3eb   :  { %564 = vmatpush.msra.mxu3 %v1518_v59 }
 0x3ec   :  { %330 = vrot.lane.b32.xlu1 %v303_v3, %s1349_s15 }
 0x3ed   :  { %v176_v61 = vpop.f32.mrf.mxu0 }
 0x3ee   :  { %v177_v2 = vadd.f32 %v1416_v5, %v176_v61 }
 0x3f4   :  { %362 = vrot.lane.b32.xlu1 %v249_v50, %s1349_s15 }
 0x45e   :  { %v331_v6 = vpop.permute.xlu1 %330 }
 0x45f   :  { %1143 = vmatmul.msk.f32.vlgmr.msrb.gmra.mxu1 %vm216_vm4, %v331_v6  ;;  %1144 = vmatmul.msk.f32.vlgmr.msrb.gmra.mxu2 %vm216_vm4, %v331_v6 }
 0x460   :  { %586 = vmatpush.msrb.mxu1 %v1432_v18  ;;  %630 = vmatpush.msrb.mxu2 %v1437_v19 }
 0x462   :  { %587 = vmatpush.msrb.mxu1 %v1439_v20  ;;  %631 = vmatpush.msrb.mxu2 %v1446_v21 }
 0x464   :  { %588 = vmatpush.msrb.mxu1 %v1448_v22  ;;  %632 = vmatpush.msrb.mxu2 %v1453_v23 }
 0x466   :  { %589 = vmatpush.msrb.mxu1 %v1460_v26  ;;  %633 = vmatpush.msrb.mxu2 %v1465_v27  ;;  %v363_v41 = vpop.permute.xlu1 %362 }
 0x467   :  { %v326_v7 = vpop.f32.mrf.mxu3 }
 0x4dc   :  { %v351_v9 = vpop.f32.mrf.mxu1 }
 0x4dd   :  { %v352_v11 = vadd.f32 %v351_v9, %v326_v7 }
 0x4df   :  { %v354_v12 = vadd.f32 %v1491_v30, %v352_v11 }
 0x4e1   :  { %v355_v14 = vmul.f32 0.5, %v354_v12 }
 0x4e2   :  { %v399_v15 = vpop.f32.mrf.mxu2 }
 0x4e3   :  { %v356_v16 = vsel %vm1419_vm3, %v354_v12, %v355_v14  ;;  %v402_v17 = vadd.f32 %v399_v15, %v174_v13 }
 0x4e4   :  { %1187 = vtanh.f32 %v356_v16 }
 0x4e5   :  { %v403_v24 = vmul.f32 0.5, %v402_v17 }
 0x4e7   :  { %v404_v25 = vsel %vm1419_vm3, %v402_v17, %v403_v24 }
 0x4e8   :  { %1189 = vtanh.f32 %v404_v25 }
 0x4ea   :  { %v1188_v28 = vpop.eup %1187 }
 0x4eb   :  { %v358_v29 = vmul.f32 0.5, %v1188_v28 }
 0x4ed   :  { %v359_v31 = vadd.f32 0.5, %v358_v29 }
 0x4ee   :  { %v1190_v32 = vpop.eup %1189 }
 0x4ef   :  { %v360_v33 = vsel %vm1419_vm3, %v1188_v28, %v359_v31  ;;  %v406_v34 = vmul.f32 0.5, %v1190_v32 }
 0x4f0   :  { %367 = vrot.lane.b32.xlu2 %v360_v33, %s1347_s3  ;;  %v365_v42 = vmul.f32 %v363_v41, %v360_v33 }
 0x4f1   :  { %v407_v35 = vadd.f32 0.5, %v406_v34 }
 0x4f3   :  { %v408_v36 = vsel %vm1419_vm3, %v1190_v32, %v407_v35 }
 0x4f4   :  { %411 = vrot.lane.b32.xlu0 %v408_v36, %s1347_s3  ;;  %v409_v46 = vmul.f32 %v408_v36, %v1526_v63 }
 0x54a   :  { %v368_v37 = vpop.permute.xlu2 %367 }
 0x54b   :  { %v370_v38 = vmul.f32 %v368_v37, %v360_v33 }
 0x54d   :  { %372 = vrot.lane.b32.xlu2 %v370_v38, %s1349_s15 }
 0x566   :  { %v412_v39 = vpop.permute.xlu0 %411 }
 0x567   :  { %v414_v40 = vmul.f32 %v412_v39, %v408_v36 }
 0x569   :  { %416 = vrot.lane.b32.xlu0 %v414_v40, %s1349_s15 }
 0x5a7   :  { %v373_v43 = vpop.permute.xlu2 %372 }
 0x5a8   :  { %v1562_v44 = vadd.f32 %v373_v43, %v365_v42 }
 0x5aa   :  { %1191 = vtanh.f32 %v1562_v44 }
 0x5b0   :  { %v1192_v45 = vpop.eup %1191 }
 0x5b1   :  { %378 = vrot.lane.b32.xlu1 %v1192_v45, %s1347_s3 }
 0x5db   :  { %v417_v47 = vpop.permute.xlu0 %416 }
 0x5dc   :  { %v1567_v48 = vadd.f32 %v417_v47, %v409_v46 }
 0x5de   :  { %1193 = vtanh.f32 %v1567_v48 }
 0x5e4   :  { %v1194_v49 = vpop.eup %1193 }
 0x5e5   :  { %422 = vrot.lane.b32.xlu2 %v1194_v49, %s1347_s3 }
 0x623   :  { %v379_v50 = vpop.permute.xlu1 %378 }
 0x624   :  { %v381_v51 = vmul.f32 %v379_v50, %v360_v33 }
 0x626   :  { %427 = vrot.lane.b32.xlu0 %v381_v51, %s1349_s15 }
 0x63f   :  { %v423_v52 = vpop.permute.xlu2 %422 }
 0x640   :  { %v425_v53 = vmul.f32 %v423_v52, %v408_v36 }
 0x642   :  { %452 = vrot.lane.b32.xlu1 %v425_v53, %s1349_s15 }
 0x698   :  { %v428_v55 = vpop.permute.xlu0 %427 }
 0x699   :  { %1145 = vmatmul.msk.f32.vlgmr.msrb.gmra.mxu3 %vm216_vm4, %v428_v55 }
 0x69a   :  { %679 = vmatpush.msrb.mxu3 %v1509_v56 }
 0x69c   :  { %680 = vmatpush.msrb.mxu3 %v1511_v57 }
 0x69e   :  { %681 = vmatpush.msrb.mxu3 %v1515_v58 }
 0x6a0   :  { %682 = vmatpush.msrb.mxu3 %v1518_v59 }
 0x6b4   :  { %v453_v60 = vpop.permute.xlu1 %452 }
 0x6b5   :  { %1146 = vmatmul.msk.f32.vlgmr.msra.gmra.mxu1 %vm216_vm4, %v453_v60  ;;  %1147 = vmatmul.msk.f32.vlgmr.msra.gmra.mxu2 %vm216_vm4, %v453_v60 }
 0x6b6   :  { %704 = vmatpush.msra.mxu1 %v1432_v18  ;;  %748 = vmatpush.msra.mxu2 %v1437_v19 }
 0x6b8   :  { %705 = vmatpush.msra.mxu1 %v1439_v20  ;;  %749 = vmatpush.msra.mxu2 %v1446_v21 }
 0x6ba   :  { %706 = vmatpush.msra.mxu1 %v1448_v22  ;;  %750 = vmatpush.msra.mxu2 %v1453_v23 }
 0x6bc   :  { %707 = vmatpush.msra.mxu1 %v1460_v26  ;;  %751 = vmatpush.msra.mxu2 %v1465_v27 }
 0x71c   :  { %v448_v62 = vpop.f32.mrf.mxu3 }
 0x732   :  { %v473_v63 = vpop.f32.mrf.mxu1 }
 0x733   :  { %v474_v0 = vadd.f32 %v473_v63, %v448_v62 }
 0x735   :  { %v476_v1 = vadd.f32 %v1491_v30, %v474_v0 }
 0x737   :  { %v477_v3 = vmul.f32 0.5, %v476_v1 }
 0x738   :  { %v517_v4 = vpop.f32.mrf.mxu2 }
 0x739   :  { %v478_v6 = vsel %vm1419_vm3, %v476_v1, %v477_v3  ;;  %v520_v7 = vadd.f32 %v517_v4, %v177_v2 }
 0x73a   :  { %1195 = vtanh.f32 %v478_v6 }
 0x73b   :  { %v521_v9 = vmul.f32 0.5, %v520_v7 }
 0x73d   :  { %v522_v10 = vsel %vm1419_vm3, %v520_v7, %v521_v9 }
 0x73e   :  { %1197 = vtanh.f32 %v522_v10 }
 0x740   :  { %v1196_v11 = vpop.eup %1195 }
 0x741   :  { %v480_v12 = vmul.f32 0.5, %v1196_v11 }
 0x743   :  { %v481_v13 = vadd.f32 0.5, %v480_v12 }
 0x744   :  { %v1198_v14 = vpop.eup %1197 }
 0x745   :  { %v482_v15 = vsel %vm1419_vm3, %v1196_v11, %v481_v13  ;;  %v524_v16 = vmul.f32 0.5, %v1198_v14 }
 0x746   :  { %485 = vrot.lane.b32.xlu2 %v482_v15, %s1347_s3  ;;  %v483_v32 = vmul.f32 %v482_v15, %v1562_v44  ;;  %v115_v44 = vld [vmem:[#allocation2 + $0x20] sm:$0xff] }
 0x747   :  { %v525_v17 = vadd.f32 0.5, %v524_v16  ;;  %1136 = vmatmul.msk.f32.gmra.mxu0 %vm125_vm0, %v115_v44 }
 0x749   :  { %v526_v24 = vsel %vm1419_vm3, %v1198_v14, %v525_v17 }
 0x74a   :  { %529 = vrot.lane.b32.xlu0 %v526_v24, %s1347_s3  ;;  %v527_v35 = vmul.f32 %v526_v24, %v1567_v48 }
 0x7a0   :  { %v486_v25 = vpop.permute.xlu2 %485 }
 0x7a1   :  { %v488_v28 = vmul.f32 %v486_v25, %v482_v15 }
 0x7a3   :  { %490 = vrot.lane.b32.xlu1 %v488_v28, %s1349_s15 }
 0x7bc   :  { %v530_v29 = vpop.permute.xlu0 %529 }
 0x7bd   :  { %v532_v31 = vmul.f32 %v530_v29, %v526_v24 }
 0x7bf   :  { %534 = vrot.lane.b32.xlu2 %v532_v31, %s1349_s15 }
 0x7c4   :  { %v179_v47 = vpop.f32.mrf.mxu0 }
 0x7c5   :  { %v180_v52 = vadd.f32 %v1416_v5, %v179_v47 }
 0x815   :  { %v491_v33 = vpop.permute.xlu1 %490 }
 0x816   :  { %v1604_v34 = vadd.f32 %v491_v33, %v483_v32 }
 0x818   :  { %1199 = vtanh.f32 %v1604_v34 }
 0x819   :  { %v535_v36 = vpop.permute.xlu2 %534 }
 0x81a   :  { %v537_v37 = vadd.f32 %v535_v36, %v527_v35  ;;  %v116_v35 = vld [vmem:[#allocation2 + $0x28] sm:$0xff] }
 0x81b   :  { %1137 = vmatmul.msk.f32.gmra.mxu0 %vm125_vm0, %v116_v35 }
 0x81c   :  { %1201 = vtanh.f32 %v537_v37 }
 0x81e   :  { %v1200_v38 = vpop.eup %1199 }
 0x81f   :  { %496 = vrot.lane.b32.xlu0 %v1200_v38, %s1347_s3 }
 0x822   :  { %v1202_v39 = vpop.eup %1201 }
 0x823   :  { %540 = vrot.lane.b32.xlu1 %v1202_v39, %s1347_s3 }
 0x891   :  { %v497_v40 = vpop.permute.xlu0 %496 }
 0x892   :  { %v499_v41 = vmul.f32 %v497_v40, %v482_v15 }
 0x894   :  { %545 = vrot.lane.b32.xlu2 %v499_v41, %s1349_s15 }
 0x895   :  { %v541_v42 = vpop.permute.xlu1 %540 }
 0x896   :  { %v543_v43 = vmul.f32 %v541_v42, %v526_v24 }
 0x898   :  { %570 = vrot.lane.b32.xlu0 %v543_v43, %s1349_s15 }
 0x8ee   :  { %v546_v45 = vpop.permute.xlu2 %545 }
 0x8ef   :  { %1148 = vmatmul.msk.f32.vlgmr.msra.gmra.mxu3 %vm216_vm4, %v546_v45 }
 0x8f0   :  { %797 = vmatpush.msra.mxu3 %v1509_v56 }
 0x8f2   :  { %798 = vmatpush.msra.mxu3 %v1511_v57 }
 0x8f4   :  { %799 = vmatpush.msra.mxu3 %v1515_v58 }
 0x8f6   :  { %800 = vmatpush.msra.mxu3 %v1518_v59 }
 0x90a   :  { %v571_v46 = vpop.permute.xlu0 %570 }
 0x90b   :  { %1149 = vmatmul.msk.f32.vlgmr.msrb.gmra.mxu1 %vm216_vm4, %v571_v46  ;;  %1150 = vmatmul.msk.f32.vlgmr.msrb.gmra.mxu2 %vm216_vm4, %v571_v46 }
 0x90c   :  { %822 = vmatpush.msrb.mxu1 %v1432_v18  ;;  %866 = vmatpush.msrb.mxu2 %v1437_v19 }
 0x90e   :  { %823 = vmatpush.msrb.mxu1 %v1439_v20  ;;  %867 = vmatpush.msrb.mxu2 %v1446_v21 }
 0x910   :  { %824 = vmatpush.msrb.mxu1 %v1448_v22  ;;  %868 = vmatpush.msrb.mxu2 %v1453_v23 }
 0x912   :  { %825 = vmatpush.msrb.mxu1 %v1460_v26  ;;  %869 = vmatpush.msrb.mxu2 %v1465_v27 }
 0x972   :  { %v566_v48 = vpop.f32.mrf.mxu3 }
 0x988   :  { %v591_v49 = vpop.f32.mrf.mxu1 }
 0x989   :  { %v592_v50 = vadd.f32 %v591_v49, %v566_v48 }
 0x98b   :  { %v594_v51 = vadd.f32 %v1491_v30, %v592_v50 }
 0x98d   :  { %v595_v53 = vmul.f32 0.5, %v594_v51 }
 0x98e   :  { %v635_v54 = vpop.f32.mrf.mxu2 }
 0x98f   :  { %v596_v55 = vsel %vm1419_vm3, %v594_v51, %v595_v53  ;;  %v638_v60 = vadd.f32 %v635_v54, %v180_v52 }
 0x990   :  { %1203 = vtanh.f32 %v596_v55 }
 0x991   :  { %v639_v61 = vmul.f32 0.5, %v638_v60 }
 0x993   :  { %v640_v62 = vsel %vm1419_vm3, %v638_v60, %v639_v61 }
 0x994   :  { %1205 = vtanh.f32 %v640_v62 }
 0x996   :  { %v1204_v63 = vpop.eup %1203 }
 0x997   :  { %v598_v0 = vmul.f32 0.5, %v1204_v63 }
 0x999   :  { %v599_v1 = vadd.f32 0.5, %v598_v0 }
 0x99a   :  { %v1206_v2 = vpop.eup %1205 }
 0x99b   :  { %v600_v3 = vsel %vm1419_vm3, %v1204_v63, %v599_v1  ;;  %v642_v4 = vmul.f32 0.5, %v1206_v2 }
 0x99c   :  { %603 = vrot.lane.b32.xlu1 %v600_v3, %s1347_s3  ;;  %v601_v17 = vmul.f32 %v600_v3, %v1604_v34 }
 0x99d   :  { %v643_v6 = vadd.f32 0.5, %v642_v4 }
 0x99f   :  { %v644_v7 = vsel %vm1419_vm3, %v1206_v2, %v643_v6 }
 0x9a0   :  { %647 = vrot.lane.b32.xlu2 %v644_v7, %s1347_s3  ;;  %v645_v13 = vmul.f32 %v644_v7, %v537_v37 }
 0x9fa   :  { %v648_v9 = vpop.permute.xlu2 %647 }
 0x9fb   :  { %v650_v10 = vmul.f32 %v648_v9, %v644_v7 }
 0x9fd   :  { %652 = vrot.lane.b32.xlu1 %v650_v10, %s1349_s15 }
 0xa0e   :  { %v604_v11 = vpop.permute.xlu1 %603 }
 0xa0f   :  { %v606_v12 = vmul.f32 %v604_v11, %v600_v3  ;;  %v117_v11 = vld [vmem:[#allocation2 + $0x30] sm:$0xff] }
 0xa10   :  { %1138 = vmatmul.msk.f32.gmra.mxu0 %vm125_vm0, %v117_v11 }
 0xa11   :  { %608 = vrot.lane.b32.xlu0 %v606_v12, %s1349_s15 }
 0xa6f   :  { %v653_v14 = vpop.permute.xlu1 %652 }
 0xa70   :  { %v1642_v15 = vadd.f32 %v653_v14, %v645_v13 }
 0xa72   :  { %1207 = vtanh.f32 %v1642_v15 }
 0xa78   :  { %v1208_v16 = vpop.eup %1207 }
 0xa79   :  { %658 = vrot.lane.b32.xlu0 %v1208_v16, %s1347_s3 }
 0xa83   :  { %v609_v24 = vpop.permute.xlu0 %608 }
 0xa84   :  { %v611_v25 = vadd.f32 %v609_v24, %v601_v17 }
 0xa86   :  { %1209 = vtanh.f32 %v611_v25 }
 0xa8c   :  { %v1210_v28 = vpop.eup %1209 }
 0xa8d   :  { %614 = vrot.lane.b32.xlu2 %v1210_v28, %s1347_s3 }
 0xae7   :  { %v615_v29 = vpop.permute.xlu2 %614 }
 0xae8   :  { %v617_v31 = vmul.f32 %v615_v29, %v600_v3 }
 0xaea   :  { %663 = vrot.lane.b32.xlu1 %v617_v31, %s1349_s15 }
 0xaeb   :  { %v659_v32 = vpop.permute.xlu0 %658 }
 0xaec   :  { %v661_v33 = vmul.f32 %v659_v32, %v644_v7 }
 0xaee   :  { %688 = vrot.lane.b32.xlu2 %v661_v33, %s1349_s15 }
 0xb48   :  { %v689_v36 = vpop.permute.xlu2 %688 }
 0xb49   :  { %1152 = vmatmul.msk.f32.vlgmr.msra.gmra.mxu1 %vm216_vm4, %v689_v36  ;;  %1153 = vmatmul.msk.f32.vlgmr.msra.gmra.mxu2 %vm216_vm4, %v689_v36 }
 0xb4a   :  { %940 = vmatpush.msra.mxu1 %v1432_v18  ;;  %984 = vmatpush.msra.mxu2 %v1437_v19  ;;  %v182_v19 = vpop.f32.mrf.mxu0 }
 0xb4c   :  { %941 = vmatpush.msra.mxu1 %v1439_v20  ;;  %985 = vmatpush.msra.mxu2 %v1446_v21  ;;  %v183_v21 = vadd.f32 %v1416_v5, %v182_v19 }
 0xb4e   :  { %942 = vmatpush.msra.mxu1 %v1448_v22  ;;  %986 = vmatpush.msra.mxu2 %v1453_v23 }
 0xb50   :  { %943 = vmatpush.msra.mxu1 %v1460_v26  ;;  %987 = vmatpush.msra.mxu2 %v1465_v27 }
 0xb52   :  { %v185_v14 = vpop.f32.mrf.mxu0 }
 0xb5c   :  { %v664_v34 = vpop.permute.xlu1 %663 }
 0xb5d   :  { %1151 = vmatmul.msk.f32.vlgmr.msrb.gmra.mxu3 %vm216_vm4, %v664_v34 }
 0xb5e   :  { %915 = vmatpush.msrb.mxu3 %v1509_v56 }
 0xb60   :  { %916 = vmatpush.msrb.mxu3 %v1511_v57 }
 0xb62   :  { %917 = vmatpush.msrb.mxu3 %v1515_v58 }
 0xb64   :  { %918 = vmatpush.msrb.mxu3 %v1518_v59 }
 0xbc6   :  { %v709_v43 = vpop.f32.mrf.mxu1 }
 0xbcc   :  { %v753_v37 = vpop.f32.mrf.mxu2 }
 0xbcd   :  { %v756_v23 = vadd.f32 %v753_v37, %v183_v21 }
 0xbcf   :  { %v757_v38 = vmul.f32 0.5, %v756_v23 }
 0xbd1   :  { %v758_v27 = vsel %vm1419_vm3, %v756_v23, %v757_v38 }
 0xbd2   :  { %1211 = vtanh.f32 %v758_v27 }
 0xbd8   :  { %v1212_v39 = vpop.eup %1211 }
 0xbd9   :  { %v760_v40 = vmul.f32 0.5, %v1212_v39 }
 0xbdb   :  { %v761_v41 = vadd.f32 0.5, %v760_v40 }
 0xbdd   :  { %v762_v42 = vsel %vm1419_vm3, %v1212_v39, %v761_v41 }
 0xbde   :  { %765 = vrot.lane.b32.xlu1 %v762_v42, %s1347_s3  ;;  %v763_v0 = vmul.f32 %v762_v42, %v1642_v15 }
 0xbe0   :  { %v684_v44 = vpop.f32.mrf.mxu3 }
 0xbe1   :  { %v710_v45 = vadd.f32 %v709_v43, %v684_v44 }
 0xbe3   :  { %v712_v46 = vadd.f32 %v1491_v30, %v710_v45 }
 0xbe5   :  { %v713_v47 = vmul.f32 0.5, %v712_v46 }
 0xbe7   :  { %v714_v48 = vsel %vm1419_vm3, %v712_v46, %v713_v47  ;;  %v118_v47 = vld [vmem:[#allocation2 + $0x38] sm:$0xff] }
 0xbe8   :  { %1213 = vtanh.f32 %v714_v48  ;;  %1139 = vmatmul.msk.f32.gmra.mxu0 %vm125_vm0, %v118_v47  ;;  %v1174_v47 = vld [vmem:[%s1779_s8] ss:$0 sm:$0xff] }
 0xbee   :  { %v1214_v49 = vpop.eup %1213 }
 0xbef   :  { %v716_v50 = vmul.f32 0.5, %v1214_v49 }
 0xbf1   :  { %v717_v51 = vadd.f32 0.5, %v716_v50 }
 0xbf3   :  { %v718_v52 = vsel %vm1419_vm3, %v1214_v49, %v717_v51 }
 0xbf4   :  { %721 = vrot.lane.b32.xlu0 %v718_v52, %s1347_s3  ;;  %v719_v61 = vmul.f32 %v718_v52, %v611_v25 }
 0xc50   :  { %v766_v53 = vpop.permute.xlu1 %765 }
 0xc51   :  { %v768_v54 = vmul.f32 %v766_v53, %v762_v42 }
 0xc53   :  { %770 = vrot.lane.b32.xlu0 %v768_v54, %s1349_s15 }
 0xc65   :  { %v188_v50 = vpop.f32.mrf.mxu0 }
 0xc66   :  { %v722_v55 = vpop.permute.xlu0 %721  ;;  %v189_v51 = vadd.f32 %v1416_v5, %v188_v50 }
 0xc67   :  { %v724_v60 = vmul.f32 %v722_v55, %v718_v52 }
 0xc69   :  { %726 = vrot.lane.b32.xlu2 %v724_v60, %s1349_s15 }
 0xcc3   :  { %v727_v62 = vpop.permute.xlu2 %726 }
 0xcc4   :  { %v1680_v63 = vadd.f32 %v727_v62, %v719_v61 }
 0xcc5   :  { %v771_v1 = vpop.permute.xlu0 %770 }
 0xcc6   :  { %1215 = vtanh.f32 %v1680_v63  ;;  %v773_v2 = vadd.f32 %v771_v1, %v763_v0 }
 0xcc8   :  { %1217 = vtanh.f32 %v773_v2 }
 0xccc   :  { %v1216_v3 = vpop.eup %1215 }
 0xccd   :  { %732 = vrot.lane.b32.xlu1 %v1216_v3, %s1347_s3 }
 0xcce   :  { %v1218_v4 = vpop.eup %1217 }
 0xccf   :  { %776 = vrot.lane.b32.xlu2 %v1218_v4, %s1347_s3 }
 0xd29   :  { %v777_v6 = vpop.permute.xlu2 %776 }
 0xd2a   :  { %v779_v7 = vmul.f32 %v777_v6, %v762_v42 }
 0xd2c   :  { %806 = vrot.lane.b32.xlu1 %v779_v7, %s1349_s15 }
 0xd3f   :  { %v733_v9 = vpop.permute.xlu1 %732 }
 0xd40   :  { %v735_v10 = vmul.f32 %v733_v9, %v718_v52 }
 0xd42   :  { %781 = vrot.lane.b32.xlu0 %v735_v10, %s1349_s15 }
 0xd9e   :  { %v807_v12 = vpop.permute.xlu1 %806 }
 0xd9f   :  { %1155 = vmatmul.msk.f32.vlgmr.msrb.gmra.mxu1 %vm216_vm4, %v807_v12  ;;  %1156 = vmatmul.msk.f32.vlgmr.msrb.gmra.mxu2 %vm216_vm4, %v807_v12 }
 0xda0   :  { %1058 = vmatpush.msrb.mxu1 %v1432_v18  ;;  %v186_v18 = vadd.f32 %v1416_v5, %v185_v14 }
 0xda2   :  { %1059 = vmatpush.msrb.mxu1 %v1439_v20 }
 0xda4   :  { %1060 = vmatpush.msrb.mxu1 %v1448_v22 }
 0xda6   :  { %1061 = vmatpush.msrb.mxu1 %v1460_v26 }
 0xdb4   :  { %v782_v13 = vpop.permute.xlu0 %781 }
 0xdb5   :  { %1154 = vmatmul.msk.f32.vlgmr.msra.gmra.mxu3 %vm216_vm4, %v782_v13 }
 0xdb6   :  { %1033 = vmatpush.msra.mxu3 %v1509_v56 }
 0xdb8   :  { %1034 = vmatpush.msra.mxu3 %v1511_v57 }
 0xdba   :  { %1035 = vmatpush.msra.mxu3 %v1515_v58 }
 0xdbc   :  { %1036 = vmatpush.msra.mxu3 %v1518_v59 }
 0xe1c   :  { %v827_v57 = vpop.f32.mrf.mxu1 }
 0xe22   :  { %v871_v15 = vpop.f32.mrf.mxu2 }
 0xe23   :  { %v874_v20 = vadd.f32 %v871_v15, %v186_v18 }
 0xe25   :  { %v875_v16 = vmul.f32 0.5, %v874_v20 }
 0xe27   :  { %v876_v22 = vsel %vm1419_vm3, %v874_v20, %v875_v16 }
 0xe28   :  { %1219 = vtanh.f32 %v876_v22 }
 0xe2e   :  { %v1220_v26 = vpop.eup %1219 }
 0xe2f   :  { %v878_v17 = vmul.f32 0.5, %v1220_v26 }
 0xe31   :  { %v879_v24 = vadd.f32 0.5, %v878_v17 }
 0xe33   :  { %v880_v56 = vsel %vm1419_vm3, %v1220_v26, %v879_v24 }
 0xe34   :  { %883 = vrot.lane.b32.xlu0 %v880_v56, %s1347_s3  ;;  %v881_v37 = vmul.f32 %v880_v56, %v773_v2 }
 0xe38   :  { %v802_v58 = vpop.f32.mrf.mxu3 }
 0xe39   :  { %v828_v59 = vadd.f32 %v827_v57, %v802_v58 }
 0xe3b   :  { %v830_v25 = vadd.f32 %v1491_v30, %v828_v59 }
 0xe3d   :  { %v831_v28 = vmul.f32 0.5, %v830_v25 }
 0xe3f   :  { %v832_v29 = vsel %vm1419_vm3, %v830_v25, %v831_v28 }
 0xe40   :  { %1221 = vtanh.f32 %v832_v29 }
 0xe46   :  { %v1222_v31 = vpop.eup %1221 }
 0xe47   :  { %v834_v32 = vmul.f32 0.5, %v1222_v31 }
 0xe49   :  { %v835_v33 = vadd.f32 0.5, %v834_v32 }
 0xe4b   :  { %v836_v35 = vsel %vm1419_vm3, %v1222_v31, %v835_v33 }
 0xe4c   :  { %839 = vrot.lane.b32.xlu2 %v836_v35, %s1347_s3  ;;  %v837_v39 = vmul.f32 %v836_v35, %v1680_v63 }
 0xea6   :  { %v884_v36 = vpop.permute.xlu0 %883  ;;  %v840_v34 = vpop.permute.xlu2 %839 }
 0xea7   :  { %v886_v19 = vmul.f32 %v884_v36, %v880_v56  ;;  %v842_v21 = vmul.f32 %v840_v34, %v836_v35 }
 0xea9   :  { %888 = vrot.lane.b32.xlu2 %v886_v19, %s1349_s15  ;;  %844 = vrot.lane.b32.xlu1 %v842_v21, %s1349_s15 }
 0xf03   :  { %v889_v23 = vpop.permute.xlu2 %888 }
 0xf04   :  { %v891_v38 = vadd.f32 %v889_v23, %v881_v37 }
 0xf06   :  { %1223 = vtanh.f32 %v891_v38 }
 0xf0c   :  { %v1224_v27 = vpop.eup %1223 }
 0xf0d   :  { %894 = vrot.lane.b32.xlu1 %v1224_v27, %s1347_s3 }
 0xf1b   :  { %v845_v40 = vpop.permute.xlu1 %844 }
 0xf1c   :  { %v847_v41 = vadd.f32 %v845_v40, %v837_v39 }
 0xf1e   :  { %1225 = vtanh.f32 %v847_v41 }
 0xf24   :  { %v1226_v42 = vpop.eup %1225 }
 0xf25   :  { %850 = vrot.lane.b32.xlu0 %v1226_v42, %s1347_s3  ;;  %v1091_v42 = vld [vmem:[%s1778_s7 + $0x8] sm:$0xff] }
 0xf7f   :  { %v895_v43 = vpop.permute.xlu1 %894 }
 0xf80   :  { %v897_v44 = vmul.f32 %v895_v43, %v880_v56  ;;  %v1090_v43 = vld [vmem:[%s1778_s7] sm:$0xff] }
 0xf82   :  { %924 = vrot.lane.b32.xlu0 %v897_v44, %s1349_s15 }
 0xf97   :  { %v851_v45 = vpop.permute.xlu0 %850 }
 0xf98   :  { %v853_v46 = vmul.f32 %v851_v45, %v836_v35 }
 0xf9a   :  { %899 = vrot.lane.b32.xlu2 %v853_v46, %s1349_s15 }
 0xff4   :  { %v900_v48 = vpop.permute.xlu2 %899  ;;  %v925_v49 = vpop.permute.xlu0 %924 }
 0xff5   :  { %1157 = vmatmul.msk.f32.vlgmr.msrb.gmra.mxu3 %vm216_vm4, %v900_v48  ;;  %1158 = vmatmul.msk.f32.vlgmr.msra.gmra.mxu1 %vm216_vm4, %v925_v49 }
 0xff6   :  { %1159 = vmatmul.msk.f32.vlgmr.msra.gmra.mxu2 %vm216_vm4, %v925_v49 }
0x1072   :  { %v945_v52 = vpop.f32.mrf.mxu1 }
0x1078   :  { %v920_v53 = vpop.f32.mrf.mxu3 }
0x1079   :  { %v946_v54 = vadd.f32 %v945_v52, %v920_v53  ;;  %v989_v55 = vpop.f32.mrf.mxu2 }
0x107a   :  { %v992_v60 = vadd.f32 %v989_v55, %v189_v51 }
0x107b   :  { %v948_v61 = vadd.f32 %v1491_v30, %v946_v54 }
0x107c   :  { %v993_v62 = vmul.f32 0.5, %v992_v60 }
0x107d   :  { %v949_v63 = vmul.f32 0.5, %v948_v61 }
0x107e   :  { %v994_v0 = vsel %vm1419_vm3, %v992_v60, %v993_v62 }
0x107f   :  { %v950_v1 = vsel %vm1419_vm3, %v948_v61, %v949_v63  ;;  %1227 = vtanh.f32 %v994_v0 }
0x1080   :  { %1229 = vtanh.f32 %v950_v1 }
0x1085   :  { %v1228_v2 = vpop.eup %1227 }
0x1086   :  { %v1230_v3 = vpop.eup %1229  ;;  %v996_v5 = vmul.f32 0.5, %v1228_v2 }
0x1087   :  { %v952_v4 = vmul.f32 0.5, %v1230_v3 }
0x1088   :  { %v997_v6 = vadd.f32 0.5, %v996_v5 }
0x1089   :  { %v953_v7 = vadd.f32 0.5, %v952_v4 }
0x108a   :  { %v998_v9 = vsel %vm1419_vm3, %v1228_v2, %v997_v6 }
0x108b   :  { %1001 = vrot.lane.b32.xlu2 %v998_v9, %s1347_s3  ;;  %v954_v10 = vsel %vm1419_vm3, %v1230_v3, %v953_v7  ;;  %v999_v18 = vmul.f32 %v998_v9, %v891_v38 }
0x108c   :  { %957 = vrot.lane.b32.xlu1 %v954_v10, %s1347_s3  ;;  %v955_v22 = vmul.f32 %v954_v10, %v847_v41  ;;  %v1093_v41 = vld [vmem:[%s1778_s7 + $0x18] sm:$0xff] }
0x108d   :  { %1115 = vmatpush.msrb.mxu2 %v1093_v41 }
0x108f   :  { %1116 = vmatpush.msrb.mxu2 %v1092_v8 }
0x1091   :  { %1117 = vmatpush.msrb.mxu2 %v1091_v42 }
0x1093   :  { %1118 = vmatpush.msrb.mxu2 %v1090_v43 }
0x10e5   :  { %v1002_v11 = vpop.permute.xlu2 %1001 }
0x10e6   :  { %v1004_v12 = vmul.f32 %v1002_v11, %v998_v9 }
0x10e8   :  { %1006 = vrot.lane.b32.xlu1 %v1004_v12, %s1349_s15 }
0x10fe   :  { %v958_v13 = vpop.permute.xlu1 %957 }
0x10ff   :  { %v960_v14 = vmul.f32 %v958_v13, %v954_v10 }
0x1101   :  { %962 = vrot.lane.b32.xlu0 %v960_v14, %s1349_s15 }
0x115a   :  { %v1007_v15 = vpop.permute.xlu1 %1006 }
0x115b   :  { %v1009_v20 = vadd.f32 %v1007_v15, %v999_v18 }
0x115d   :  { %1231 = vtanh.f32 %v1009_v20 }
0x1163   :  { %v1232_v16 = vpop.eup %1231 }
0x1164   :  { %1012 = vrot.lane.b32.xlu0 %v1232_v16, %s1347_s3 }
0x1173   :  { %v963_v26 = vpop.permute.xlu0 %962 }
0x1174   :  { %v965_v17 = vadd.f32 %v963_v26, %v955_v22 }
0x1176   :  { %1233 = vtanh.f32 %v965_v17 }
0x117c   :  { %v1234_v24 = vpop.eup %1233 }
0x117d   :  { %968 = vrot.lane.b32.xlu2 %v1234_v24, %s1347_s3 }
0x11d6   :  { %v1013_v56 = vpop.permute.xlu0 %1012 }
0x11d7   :  { %v1015_v57 = vmul.f32 %v1013_v56, %v998_v9  ;;  %v969_v58 = vpop.permute.xlu2 %968 }
0x11d8   :  { %v971_v59 = vmul.f32 %v969_v58, %v954_v10 }
0x11d9   :  { %1042 = vrot.lane.b32.xlu2 %v1015_v57, %s1349_s15 }
0x11da   :  { %1017 = vrot.lane.b32.xlu1 %v971_v59, %s1349_s15 }
0x1233   :  { %v1043_v25 = vpop.permute.xlu2 %1042 }
0x1234   :  { %1161 = vmatmul.msk.f32.vlgmr.msrb.gmra.mxu1 %vm216_vm4, %v1043_v25 }
0x124c   :  { %v1018_v28 = vpop.permute.xlu1 %1017 }
0x124d   :  { %1160 = vmatmul.msk.f32.vlgmr.msra.gmra.mxu3 %vm216_vm4, %v1018_v28 }
0x12b1   :  { %v1063_v29 = vpop.f32.mrf.mxu1 }
0x12d0   :  { %v1038_v31 = vpop.f32.mrf.mxu3 }
0x12d1   :  { %v1064_v32 = vadd.f32 %v1063_v29, %v1038_v31 }
0x12d3   :  { %v1066_v33 = vadd.f32 %v1491_v30, %v1064_v32 }
0x12d5   :  { %v1067_v35 = vmul.f32 0.5, %v1066_v33 }
0x12d7   :  { %v1068_v36 = vsel %vm1419_vm3, %v1066_v33, %v1067_v35 }
0x12d8   :  { %1235 = vtanh.f32 %v1068_v36 }
0x12de   :  { %v1236_v34 = vpop.eup %1235 }
0x12df   :  { %v1070_v19 = vmul.f32 0.5, %v1236_v34 }
0x12e1   :  { %v1071_v21 = vadd.f32 0.5, %v1070_v19 }
0x12e3   :  { %v1072_v37 = vsel %vm1419_vm3, %v1236_v34, %v1071_v21 }
0x12e4   :  { %1075 = vrot.lane.b32.xlu0 %v1072_v37, %s1347_s3  ;;  %v1073_v27 = vmul.f32 %v1072_v37, %v965_v17 }
0x1356   :  { %v1076_v23 = vpop.permute.xlu0 %1075 }
0x1357   :  { %v1078_v38 = vmul.f32 %v1076_v23, %v1072_v37 }
0x1359   :  { %1080 = vrot.lane.b32.xlu1 %v1078_v38, %s1349_s15 }
0x13cb   :  { %v1081_v39 = vpop.permute.xlu1 %1080 }
0x13cc   :  { %v1083_v30 = vadd.f32 %v1081_v39, %v1073_v27 }
0x13ce   :  { %1237 = vtanh.f32 %v1083_v30 }
0x13d4   :  { %v1238_v40 = vpop.eup %1237 }
0x13d5   :  { %1086 = vrot.lane.b32.xlu2 %v1238_v40, %s1347_s3 }
0x142f   :  { %v1087_v44 = vpop.permute.xlu2 %1086 }
0x1430   :  { %v1089_v45 = vmul.f32 %v1087_v44, %v1072_v37 }
0x1432   :  { %1099 = vrot.lane.b32.xlu0 %v1089_v45, %s1349_s15 }
0x14a4   :  { %v1100_v46 = vpop.permute.xlu0 %1099 }
0x14a5   :  { %1162 = vmatmul.msk.f32.vlgmr.msrb.gmra.mxu2 %vm216_vm4, %v1100_v46 }
0x1528   :  { %v1120_v48 = vpop.f32.mrf.mxu2 }
0x1529   :  { %v1121_v49 = vadd.f32 %v1174_v47, %v1120_v48 }
0x152b   :  { %1124 = vst.msk [vmem:[%s1780_s9] sm:$0xff] %vm1123_vm5, %v1121_v49 }
0x152c   :  { %1129 = vsyncpa [#allocation3], 1 }
0x152d   :  { %1130 = vsyncpa [#allocation5], 1 }
0x152e   :  { %1131 = vsyncpa [#allocation8], 1 }

</bundles_post_ra>
